<compile_context>
chip_gen: v7x
topology: tpu7x:2x2x1
jax: 0.10.0
libtpu: 0.0.40
codegen_flags: <defaults>
</compile_context>

<pallas_src>
import functools

import jax
import jax.numpy as jnp
from jax.experimental import pallas as pl
from jax.experimental.pallas import tpu as pltpu


# ----------------------------------------------------------------------------
# Fused kernel: embedding gather + depth-stacked LSTM + final Linear.
# ----------------------------------------------------------------------------
def fused_lstm_classifier_kernel(ids_ref, emb_ref, w_ih_ref, w_hh_ref, b_ref,
                                 w_out_ref, b_out_ref, out_ref, seq_sc):
    # ids_ref:   (L, B) int32        SMEM token ids
    # emb_ref:   (vocab, 1, n_d) bf16 VMEM embedding table
    # w_ih_ref:  (depth, Din, 4H) bf16
    # w_hh_ref:  (depth, H,   4H) bf16
    # b_ref:     (depth, 1,   4H) f32   (b_ih + b_hh)
    # w_out_ref: (H, Cpad) bf16, b_out_ref: (1, Cpad) f32
    # out_ref:   (Bp, Cpad) f32
    # seq_sc:    (L*Bp, H) bf16 scratch -- layer input/output sequence (reused)
    L, B = ids_ref.shape
    depth, H, H4 = w_hh_ref.shape
    LBp, _ = seq_sc.shape
    Bp = LBp // L

    # ---- fused embedding lookup + batch pad (pad rows stay zero) ----------
    seq_sc[...] = jnp.zeros_like(seq_sc)
    for t in range(L):
        for b in range(B):
            tok = ids_ref[t, b]                      # scalar from SMEM
            # dynamic leading-axis gather from the VMEM table -> (1, n_d)
            seq_sc[pl.ds(t * Bp + b, 1), :] = emb_ref[tok]

    # ---- per-lane constants for the single-tanh gate activation -----------
    # i/f/o lanes: sigmoid(x) = 0.5 * tanh(0.5*x) + 0.5 ; g lanes: tanh(x).
    lane = jax.lax.broadcasted_iota(jnp.int32, (1, H4), 1)
    is_g = jnp.logical_and(lane >= 2 * H, lane < 3 * H)
    pre = jnp.where(is_g, 1.0, 0.5).astype(jnp.float32)   # pre-scale
    post_m = pre                                           # post-scale (same)
    post_a = jnp.where(is_g, 0.0, 0.5).astype(jnp.float32)  # post-offset

    h_bf = jnp.zeros((Bp, H), jnp.bfloat16)
    for layer in range(depth):
        # Hoisted input projection: one (L*Bp, Din) @ (Din, 4H) MXU matmul;
        # result (8 f32 vregs) stays in registers, sliced statically below.
        gx = jnp.dot(seq_sc[...], w_ih_ref[layer],
                     preferred_element_type=jnp.float32) + b_ref[layer]

        w_hh = w_hh_ref[layer]                 # (H, 4H) bf16, held in vregs

        c = jnp.zeros((Bp, H), jnp.float32)
        h_bf = jnp.zeros((Bp, H), jnp.bfloat16)
        for t in range(L):                     # static time loop
            g_slice = gx[t * Bp:(t + 1) * Bp, :]
            if t == 0:
                gates = g_slice                # h0 == 0 -> skip h @ W_hh
            else:
                gates = g_slice + jnp.dot(h_bf, w_hh,
                                          preferred_element_type=jnp.float32)
            # One packed EUP pass over (Bp, 4H) for all gates.
            act = jnp.tanh(gates * pre) * post_m + post_a
            i_g = act[:, 0 * H:1 * H]
            f_g = act[:, 1 * H:2 * H]
            g_g = act[:, 2 * H:3 * H]
            o_g = act[:, 3 * H:4 * H]
            c = f_g * c + i_g * g_g
            h = o_g * jnp.tanh(c)
            h_bf = h.astype(jnp.bfloat16)      # single cast, reused below
            if layer < depth - 1:
                # Feed the next layer's hoisted matmul (aligned, static slice).
                seq_sc[pl.ds(t * Bp, Bp), :] = h_bf

    # feat = output[-1] (== h of the top layer at t = L-1); dropout = identity.
    logits = jnp.dot(h_bf, w_out_ref[...],
                     preferred_element_type=jnp.float32) + b_out_ref[...]
    out_ref[...] = logits


# ----------------------------------------------------------------------------
# Full Model.forward (eval mode: dropouts are identity)
# ----------------------------------------------------------------------------
@functools.partial(jax.jit, static_argnames=("depth", "nclasses"))
def model_forward(token_ids, params, depth, nclasses):
    L, B = token_ids.shape
    d = params["w_hh"].shape[1]
    din = params["w_ih"].shape[1]
    c_pad = params["w_out_p"].shape[1]

    # Batch padded to the f32 sublane count (8) *inside* the kernel; only the
    # final slice back to (B, nclasses) lives outside.
    Bp = max(8, ((B + 7) // 8) * 8)

    flops = (2 * depth * (L * Bp * din * 4 * d + (L - 1) * Bp * d * 4 * d)
             + 2 * Bp * d * c_pad)
    transcendentals = depth * L * Bp * (4 * d + d)
    bytes_accessed = (token_ids.size * 4
                      + params["emb"].size * 2
                      + params["w_ih"].size * 2
                      + params["w_hh"].size * 2
                      + params["b"].size * 4
                      + params["w_out_p"].size * 2
                      + params["b_out_p"].size * 4
                      + Bp * c_pad * 4)

    out = pl.pallas_call(
        fused_lstm_classifier_kernel,
        out_shape=jax.ShapeDtypeStruct((Bp, c_pad), jnp.float32),
        in_specs=[
            pl.BlockSpec(memory_space=pltpu.MemorySpace.SMEM),   # token ids
            pl.BlockSpec(memory_space=pltpu.MemorySpace.VMEM),   # emb table
            pl.BlockSpec(memory_space=pltpu.MemorySpace.VMEM),   # w_ih
            pl.BlockSpec(memory_space=pltpu.MemorySpace.VMEM),   # w_hh
            pl.BlockSpec(memory_space=pltpu.MemorySpace.VMEM),   # b
            pl.BlockSpec(memory_space=pltpu.MemorySpace.VMEM),   # w_out
            pl.BlockSpec(memory_space=pltpu.MemorySpace.VMEM),   # b_out
        ],
        out_specs=pl.BlockSpec(memory_space=pltpu.MemorySpace.VMEM),
        scratch_shapes=[
            pltpu.VMEM((L * Bp, d), jnp.bfloat16),   # inter-layer sequence
        ],
        cost_estimate=pl.CostEstimate(flops=flops,
                                      transcendentals=transcendentals,
                                      bytes_accessed=bytes_accessed),
    )(token_ids, params["emb"], params["w_ih"], params["w_hh"], params["b"],
      params["w_out_p"], params["b_out_p"])

    # Slice away batch / class padding -> (B, nclasses) f32 logits.
    return out[:B, :nclasses]


def make_params(key, vocab, n_d, d, depth, nclasses):
    # Fused kernel stacks per-layer weights, which requires n_d == d
    # (true for the chosen config: n_d = d = 32).
    assert n_d == d, "fused kernel requires emb dim == hidden dim"
    params = {}
    key, k_emb = jax.random.split(key)
    emb = 0.1 * jax.random.normal(k_emb, (vocab, n_d), jnp.float32)
    # (vocab, 1, n_d) so the kernel can gather rows with a dynamic leading
    # index; bf16 so gathered rows feed the MXU matmul directly.
    params["emb"] = emb.reshape(vocab, 1, n_d).astype(jnp.bfloat16)

    w_ih_t, w_hh_t, b = [], [], []
    for layer in range(depth):
        din = n_d if layer == 0 else d
        key, k1, k2, k3, k4 = jax.random.split(key, 5)
        # PyTorch stores weight_ih (4H, Din), weight_hh (4H, H); pre-transpose.
        w_ih = 0.1 * jax.random.normal(k1, (4 * d, din), jnp.float32)
        w_hh = 0.1 * jax.random.normal(k2, (4 * d, d), jnp.float32)
        b_ih = 0.1 * jax.random.normal(k3, (4 * d,), jnp.float32)
        b_hh = 0.1 * jax.random.normal(k4, (4 * d,), jnp.float32)
        w_ih_t.append(w_ih.T)                       # (Din, 4H)
        w_hh_t.append(w_hh.T)                       # (H, 4H)
        b.append((b_ih + b_hh).reshape(1, 4 * d))   # (1, 4H)
    # bf16 MXU inputs, f32 accumulation / gate math inside the kernel.
    params["w_ih"] = jnp.stack(w_ih_t).astype(jnp.bfloat16)  # (depth, Din, 4H)
    params["w_hh"] = jnp.stack(w_hh_t).astype(jnp.bfloat16)  # (depth, H, 4H)
    params["b"] = jnp.stack(b)                               # (depth, 1, 4H) f32

    key, k5, k6 = jax.random.split(key, 3)
    w_out = 0.1 * jax.random.normal(k5, (nclasses, d), jnp.float32)  # PyTorch (C, H)
    b_out = 0.1 * jax.random.normal(k6, (nclasses,), jnp.float32)
    # Pad classifier output to 128 lanes so the kernel's only HBM store is
    # lane-dense; logits are sliced back to nclasses outside the kernel.
    c_pad = 128
    w_out_p = jnp.zeros((d, c_pad), jnp.float32).at[:, :nclasses].set(w_out.T)
    b_out_p = jnp.zeros((1, c_pad), jnp.float32).at[:, :nclasses].set(b_out)
    params["w_out_p"] = w_out_p.astype(jnp.bfloat16)  # (H, Cpad)
    params["b_out_p"] = b_out_p                       # (1, Cpad) f32
    return params


if __name__ == "__main__":
    # Small shapes consistent with the module:
    L, B = 8, 2            # sequence length, batch (time-major)
    VOCAB = 50
    N_D = 32               # emb_layer.n_d
    D = 32                 # args.d (LSTM hidden)
    DEPTH = 2              # args.depth
    NCLASSES = 2

    key = jax.random.PRNGKey(0)
    key, k_tok = jax.random.split(key)
    token_ids = jax.random.randint(k_tok, (L, B), 0, VOCAB, dtype=jnp.int32)

    params = make_params(key, VOCAB, N_D, D, DEPTH, NCLASSES)

    logits = model_forward(token_ids, params, DEPTH, NCLASSES)
    jax.block_until_ready(logits)
    assert logits.shape == (B, NCLASSES) and logits.dtype == jnp.float32
    print("KERNEL_OK")
</pallas_src>

<mosaic_0001>
module attributes {stable_mosaic.version = 11 : i64} {
  func.func @fused_lstm_classifier_kernel(%arg0: memref<8x2xi32, #tpu.memory_space<smem>>, %arg1: memref<50x1x32xbf16, #tpu.memory_space<vmem>>, %arg2: memref<2x32x128xbf16, #tpu.memory_space<vmem>>, %arg3: memref<2x32x128xbf16, #tpu.memory_space<vmem>>, %arg4: memref<2x1x128xf32, #tpu.memory_space<vmem>>, %arg5: memref<32x128xbf16, #tpu.memory_space<vmem>>, %arg6: memref<1x128xf32, #tpu.memory_space<vmem>>, %arg7: memref<8x128xf32, #tpu.memory_space<vmem>>, %arg8: memref<64x32xbf16, #tpu.memory_space<vmem>>) attributes {dimension_semantics = [], scalar_prefetch = 0 : i64, scratch_operands = 1 : i64, tpu.core_type = #tpu.core_type<tc>} {
    %cst = arith.constant 0.000000e+00 : bf16
    %0 = vector.broadcast %cst : bf16 to vector<64x32xbf16>
    %c0 = arith.constant 0 : index
    %c0_0 = arith.constant 0 : index
    %1 = vector.load %arg8[%c0, %c0_0] : memref<64x32xbf16, #tpu.memory_space<vmem>>, vector<64x32xbf16>
    tpu.vector_store %arg8[%c0, %c0_0], %0 {strides = array<i32>} : memref<64x32xbf16, #tpu.memory_space<vmem>>, vector<64x32xbf16>,
    %c0_1 = arith.constant 0 : index
    %c0_2 = arith.constant 0 : index
    %2 = memref.load %arg0[%c0_1, %c0_2] : memref<8x2xi32, #tpu.memory_space<smem>>
    %3 = arith.index_cast %2 : i32 to index
    %c0_3 = arith.constant 0 : index
    %c0_4 = arith.constant 0 : index
    %4 = vector.load %arg1[%3, %c0_3, %c0_4] : memref<50x1x32xbf16, #tpu.memory_space<vmem>>, vector<1x1x32xbf16>
    %5 = vector.shape_cast %4 : vector<1x1x32xbf16> to vector<1x32xbf16>
    %c0_5 = arith.constant 0 : index
    %c0_6 = arith.constant 0 : index
    %6 = vector.load %arg8[%c0_5, %c0_6] : memref<64x32xbf16, #tpu.memory_space<vmem>>, vector<1x32xbf16>
    tpu.vector_store %arg8[%c0_5, %c0_6], %5 {strides = array<i32>} : memref<64x32xbf16, #tpu.memory_space<vmem>>, vector<1x32xbf16>,
    %c0_7 = arith.constant 0 : index
    %c1 = arith.constant 1 : index
    %7 = memref.load %arg0[%c0_7, %c1] : memref<8x2xi32, #tpu.memory_space<smem>>
    %8 = arith.index_cast %7 : i32 to index
    %c0_8 = arith.constant 0 : index
    %c0_9 = arith.constant 0 : index
    %9 = vector.load %arg1[%8, %c0_8, %c0_9] : memref<50x1x32xbf16, #tpu.memory_space<vmem>>, vector<1x1x32xbf16>
    %10 = vector.shape_cast %9 : vector<1x1x32xbf16> to vector<1x32xbf16>
    %c1_10 = arith.constant 1 : index
    %c0_11 = arith.constant 0 : index
    %11 = vector.load %arg8[%c1_10, %c0_11] : memref<64x32xbf16, #tpu.memory_space<vmem>>, vector<1x32xbf16>
    tpu.vector_store %arg8[%c1_10, %c0_11], %10 {strides = array<i32>} : memref<64x32xbf16, #tpu.memory_space<vmem>>, vector<1x32xbf16>,
    %c1_12 = arith.constant 1 : index
    %c0_13 = arith.constant 0 : index
    %12 = memref.load %arg0[%c1_12, %c0_13] : memref<8x2xi32, #tpu.memory_space<smem>>
    %13 = arith.index_cast %12 : i32 to index
    %c0_14 = arith.constant 0 : index
    %c0_15 = arith.constant 0 : index
    %14 = vector.load %arg1[%13, %c0_14, %c0_15] : memref<50x1x32xbf16, #tpu.memory_space<vmem>>, vector<1x1x32xbf16>
    %15 = vector.shape_cast %14 : vector<1x1x32xbf16> to vector<1x32xbf16>
    %c8 = arith.constant 8 : index
    %c0_16 = arith.constant 0 : index
    %16 = vector.load %arg8[%c8, %c0_16] : memref<64x32xbf16, #tpu.memory_space<vmem>>, vector<1x32xbf16>
    tpu.vector_store %arg8[%c8, %c0_16], %15 {strides = array<i32>} : memref<64x32xbf16, #tpu.memory_space<vmem>>, vector<1x32xbf16>,
    %c1_17 = arith.constant 1 : index
    %c1_18 = arith.constant 1 : index
    %17 = memref.load %arg0[%c1_17, %c1_18] : memref<8x2xi32, #tpu.memory_space<smem>>
    %18 = arith.index_cast %17 : i32 to index
    %c0_19 = arith.constant 0 : index
    %c0_20 = arith.constant 0 : index
    %19 = vector.load %arg1[%18, %c0_19, %c0_20] : memref<50x1x32xbf16, #tpu.memory_space<vmem>>, vector<1x1x32xbf16>
    %20 = vector.shape_cast %19 : vector<1x1x32xbf16> to vector<1x32xbf16>
    %c9 = arith.constant 9 : index
    %c0_21 = arith.constant 0 : index
    %21 = vector.load %arg8[%c9, %c0_21] : memref<64x32xbf16, #tpu.memory_space<vmem>>, vector<1x32xbf16>
    tpu.vector_store %arg8[%c9, %c0_21], %20 {strides = array<i32>} : memref<64x32xbf16, #tpu.memory_space<vmem>>, vector<1x32xbf16>,
    %c2 = arith.constant 2 : index
    %c0_22 = arith.constant 0 : index
    %22 = memref.load %arg0[%c2, %c0_22] : memref<8x2xi32, #tpu.memory_space<smem>>
    %23 = arith.index_cast %22 : i32 to index
    %c0_23 = arith.constant 0 : index
    %c0_24 = arith.constant 0 : index
    %24 = vector.load %arg1[%23, %c0_23, %c0_24] : memref<50x1x32xbf16, #tpu.memory_space<vmem>>, vector<1x1x32xbf16>
    %25 = vector.shape_cast %24 : vector<1x1x32xbf16> to vector<1x32xbf16>
    %c16 = arith.constant 16 : index
    %c0_25 = arith.constant 0 : index
    %26 = vector.load %arg8[%c16, %c0_25] : memref<64x32xbf16, #tpu.memory_space<vmem>>, vector<1x32xbf16>
    tpu.vector_store %arg8[%c16, %c0_25], %25 {strides = array<i32>} : memref<64x32xbf16, #tpu.memory_space<vmem>>, vector<1x32xbf16>,
    %c2_26 = arith.constant 2 : index
    %c1_27 = arith.constant 1 : index
    %27 = memref.load %arg0[%c2_26, %c1_27] : memref<8x2xi32, #tpu.memory_space<smem>>
    %28 = arith.index_cast %27 : i32 to index
    %c0_28 = arith.constant 0 : index
    %c0_29 = arith.constant 0 : index
    %29 = vector.load %arg1[%28, %c0_28, %c0_29] : memref<50x1x32xbf16, #tpu.memory_space<vmem>>, vector<1x1x32xbf16>
    %30 = vector.shape_cast %29 : vector<1x1x32xbf16> to vector<1x32xbf16>
    %c17 = arith.constant 17 : index
    %c0_30 = arith.constant 0 : index
    %31 = vector.load %arg8[%c17, %c0_30] : memref<64x32xbf16, #tpu.memory_space<vmem>>, vector<1x32xbf16>
    tpu.vector_store %arg8[%c17, %c0_30], %30 {strides = array<i32>} : memref<64x32xbf16, #tpu.memory_space<vmem>>, vector<1x32xbf16>,
    %c3 = arith.constant 3 : index
    %c0_31 = arith.constant 0 : index
    %32 = memref.load %arg0[%c3, %c0_31] : memref<8x2xi32, #tpu.memory_space<smem>>
    %33 = arith.index_cast %32 : i32 to index
    %c0_32 = arith.constant 0 : index
    %c0_33 = arith.constant 0 : index
    %34 = vector.load %arg1[%33, %c0_32, %c0_33] : memref<50x1x32xbf16, #tpu.memory_space<vmem>>, vector<1x1x32xbf16>
    %35 = vector.shape_cast %34 : vector<1x1x32xbf16> to vector<1x32xbf16>
    %c24 = arith.constant 24 : index
    %c0_34 = arith.constant 0 : index
    %36 = vector.load %arg8[%c24, %c0_34] : memref<64x32xbf16, #tpu.memory_space<vmem>>, vector<1x32xbf16>
    tpu.vector_store %arg8[%c24, %c0_34], %35 {strides = array<i32>} : memref<64x32xbf16, #tpu.memory_space<vmem>>, vector<1x32xbf16>,
    %c3_35 = arith.constant 3 : index
    %c1_36 = arith.constant 1 : index
    %37 = memref.load %arg0[%c3_35, %c1_36] : memref<8x2xi32, #tpu.memory_space<smem>>
    %38 = arith.index_cast %37 : i32 to index
    %c0_37 = arith.constant 0 : index
    %c0_38 = arith.constant 0 : index
    %39 = vector.load %arg1[%38, %c0_37, %c0_38] : memref<50x1x32xbf16, #tpu.memory_space<vmem>>, vector<1x1x32xbf16>
    %40 = vector.shape_cast %39 : vector<1x1x32xbf16> to vector<1x32xbf16>
    %c25 = arith.constant 25 : index
    %c0_39 = arith.constant 0 : index
    %41 = vector.load %arg8[%c25, %c0_39] : memref<64x32xbf16, #tpu.memory_space<vmem>>, vector<1x32xbf16>
    tpu.vector_store %arg8[%c25, %c0_39], %40 {strides = array<i32>} : memref<64x32xbf16, #tpu.memory_space<vmem>>, vector<1x32xbf16>,
    %c4 = arith.constant 4 : index
    %c0_40 = arith.constant 0 : index
    %42 = memref.load %arg0[%c4, %c0_40] : memref<8x2xi32, #tpu.memory_space<smem>>
    %43 = arith.index_cast %42 : i32 to index
    %c0_41 = arith.constant 0 : index
    %c0_42 = arith.constant 0 : index
    %44 = vector.load %arg1[%43, %c0_41, %c0_42] : memref<50x1x32xbf16, #tpu.memory_space<vmem>>, vector<1x1x32xbf16>
    %45 = vector.shape_cast %44 : vector<1x1x32xbf16> to vector<1x32xbf16>
    %c32 = arith.constant 32 : index
    %c0_43 = arith.constant 0 : index
    %46 = vector.load %arg8[%c32, %c0_43] : memref<64x32xbf16, #tpu.memory_space<vmem>>, vector<1x32xbf16>
    tpu.vector_store %arg8[%c32, %c0_43], %45 {strides = array<i32>} : memref<64x32xbf16, #tpu.memory_space<vmem>>, vector<1x32xbf16>,
    %c4_44 = arith.constant 4 : index
    %c1_45 = arith.constant 1 : index
    %47 = memref.load %arg0[%c4_44, %c1_45] : memref<8x2xi32, #tpu.memory_space<smem>>
    %48 = arith.index_cast %47 : i32 to index
    %c0_46 = arith.constant 0 : index
    %c0_47 = arith.constant 0 : index
    %49 = vector.load %arg1[%48, %c0_46, %c0_47] : memref<50x1x32xbf16, #tpu.memory_space<vmem>>, vector<1x1x32xbf16>
    %50 = vector.shape_cast %49 : vector<1x1x32xbf16> to vector<1x32xbf16>
    %c33 = arith.constant 33 : index
    %c0_48 = arith.constant 0 : index
    %51 = vector.load %arg8[%c33, %c0_48] : memref<64x32xbf16, #tpu.memory_space<vmem>>, vector<1x32xbf16>
    tpu.vector_store %arg8[%c33, %c0_48], %50 {strides = array<i32>} : memref<64x32xbf16, #tpu.memory_space<vmem>>, vector<1x32xbf16>,
    %c5 = arith.constant 5 : index
    %c0_49 = arith.constant 0 : index
    %52 = memref.load %arg0[%c5, %c0_49] : memref<8x2xi32, #tpu.memory_space<smem>>
    %53 = arith.index_cast %52 : i32 to index
    %c0_50 = arith.constant 0 : index
    %c0_51 = arith.constant 0 : index
    %54 = vector.load %arg1[%53, %c0_50, %c0_51] : memref<50x1x32xbf16, #tpu.memory_space<vmem>>, vector<1x1x32xbf16>
    %55 = vector.shape_cast %54 : vector<1x1x32xbf16> to vector<1x32xbf16>
    %c40 = arith.constant 40 : index
    %c0_52 = arith.constant 0 : index
    %56 = vector.load %arg8[%c40, %c0_52] : memref<64x32xbf16, #tpu.memory_space<vmem>>, vector<1x32xbf16>
    tpu.vector_store %arg8[%c40, %c0_52], %55 {strides = array<i32>} : memref<64x32xbf16, #tpu.memory_space<vmem>>, vector<1x32xbf16>,
    %c5_53 = arith.constant 5 : index
    %c1_54 = arith.constant 1 : index
    %57 = memref.load %arg0[%c5_53, %c1_54] : memref<8x2xi32, #tpu.memory_space<smem>>
    %58 = arith.index_cast %57 : i32 to index
    %c0_55 = arith.constant 0 : index
    %c0_56 = arith.constant 0 : index
    %59 = vector.load %arg1[%58, %c0_55, %c0_56] : memref<50x1x32xbf16, #tpu.memory_space<vmem>>, vector<1x1x32xbf16>
    %60 = vector.shape_cast %59 : vector<1x1x32xbf16> to vector<1x32xbf16>
    %c41 = arith.constant 41 : index
    %c0_57 = arith.constant 0 : index
    %61 = vector.load %arg8[%c41, %c0_57] : memref<64x32xbf16, #tpu.memory_space<vmem>>, vector<1x32xbf16>
    tpu.vector_store %arg8[%c41, %c0_57], %60 {strides = array<i32>} : memref<64x32xbf16, #tpu.memory_space<vmem>>, vector<1x32xbf16>,
    %c6 = arith.constant 6 : index
    %c0_58 = arith.constant 0 : index
    %62 = memref.load %arg0[%c6, %c0_58] : memref<8x2xi32, #tpu.memory_space<smem>>
    %63 = arith.index_cast %62 : i32 to index
    %c0_59 = arith.constant 0 : index
    %c0_60 = arith.constant 0 : index
    %64 = vector.load %arg1[%63, %c0_59, %c0_60] : memref<50x1x32xbf16, #tpu.memory_space<vmem>>, vector<1x1x32xbf16>
    %65 = vector.shape_cast %64 : vector<1x1x32xbf16> to vector<1x32xbf16>
    %c48 = arith.constant 48 : index
    %c0_61 = arith.constant 0 : index
    %66 = vector.load %arg8[%c48, %c0_61] : memref<64x32xbf16, #tpu.memory_space<vmem>>, vector<1x32xbf16>
    tpu.vector_store %arg8[%c48, %c0_61], %65 {strides = array<i32>} : memref<64x32xbf16, #tpu.memory_space<vmem>>, vector<1x32xbf16>,
    %c6_62 = arith.constant 6 : index
    %c1_63 = arith.constant 1 : index
    %67 = memref.load %arg0[%c6_62, %c1_63] : memref<8x2xi32, #tpu.memory_space<smem>>
    %68 = arith.index_cast %67 : i32 to index
    %c0_64 = arith.constant 0 : index
    %c0_65 = arith.constant 0 : index
    %69 = vector.load %arg1[%68, %c0_64, %c0_65] : memref<50x1x32xbf16, #tpu.memory_space<vmem>>, vector<1x1x32xbf16>
    %70 = vector.shape_cast %69 : vector<1x1x32xbf16> to vector<1x32xbf16>
    %c49 = arith.constant 49 : index
    %c0_66 = arith.constant 0 : index
    %71 = vector.load %arg8[%c49, %c0_66] : memref<64x32xbf16, #tpu.memory_space<vmem>>, vector<1x32xbf16>
    tpu.vector_store %arg8[%c49, %c0_66], %70 {strides = array<i32>} : memref<64x32xbf16, #tpu.memory_space<vmem>>, vector<1x32xbf16>,
    %c7 = arith.constant 7 : index
    %c0_67 = arith.constant 0 : index
    %72 = memref.load %arg0[%c7, %c0_67] : memref<8x2xi32, #tpu.memory_space<smem>>
    %73 = arith.index_cast %72 : i32 to index
    %c0_68 = arith.constant 0 : index
    %c0_69 = arith.constant 0 : index
    %74 = vector.load %arg1[%73, %c0_68, %c0_69] : memref<50x1x32xbf16, #tpu.memory_space<vmem>>, vector<1x1x32xbf16>
    %75 = vector.shape_cast %74 : vector<1x1x32xbf16> to vector<1x32xbf16>
    %c56 = arith.constant 56 : index
    %c0_70 = arith.constant 0 : index
    %76 = vector.load %arg8[%c56, %c0_70] : memref<64x32xbf16, #tpu.memory_space<vmem>>, vector<1x32xbf16>
    tpu.vector_store %arg8[%c56, %c0_70], %75 {strides = array<i32>} : memref<64x32xbf16, #tpu.memory_space<vmem>>, vector<1x32xbf16>,
    %c7_71 = arith.constant 7 : index
    %c1_72 = arith.constant 1 : index
    %77 = memref.load %arg0[%c7_71, %c1_72] : memref<8x2xi32, #tpu.memory_space<smem>>
    %78 = arith.index_cast %77 : i32 to index
    %c0_73 = arith.constant 0 : index
    %c0_74 = arith.constant 0 : index
    %79 = vector.load %arg1[%78, %c0_73, %c0_74] : memref<50x1x32xbf16, #tpu.memory_space<vmem>>, vector<1x1x32xbf16>
    %80 = vector.shape_cast %79 : vector<1x1x32xbf16> to vector<1x32xbf16>
    %c57 = arith.constant 57 : index
    %c0_75 = arith.constant 0 : index
    %81 = vector.load %arg8[%c57, %c0_75] : memref<64x32xbf16, #tpu.memory_space<vmem>>, vector<1x32xbf16>
    tpu.vector_store %arg8[%c57, %c0_75], %80 {strides = array<i32>} : memref<64x32xbf16, #tpu.memory_space<vmem>>, vector<1x32xbf16>,
    %82 = tpu.iota {dimensions = array<i32: 1>} : vector<1x128xi32>
    %c64_i32 = arith.constant 64 : i32
    %83 = vector.broadcast %c64_i32 : i32 to vector<1x128xi32>
    %84 = arith.cmpi sge, %82, %83 : vector<1x128xi32>
    %c96_i32 = arith.constant 96 : i32
    %85 = vector.broadcast %c96_i32 : i32 to vector<1x128xi32>
    %86 = arith.cmpi slt, %82, %85 : vector<1x128xi32>
    %87 = arith.andi %84, %86 : vector<1x128xi1>
    %cst_76 = arith.constant 1.000000e+00 : f32
    %cst_77 = arith.constant 5.000000e-01 : f32
    %88 = vector.broadcast %cst_76 : f32 to vector<1x128xf32>
    %89 = vector.broadcast %cst_77 : f32 to vector<1x128xf32>
    %90 = arith.select %87, %88, %89 : vector<1x128xi1>, vector<1x128xf32>
    %cst_78 = arith.constant 0.000000e+00 : f32
    %cst_79 = arith.constant 5.000000e-01 : f32
    %91 = vector.broadcast %cst_78 : f32 to vector<1x128xf32>
    %92 = vector.broadcast %cst_79 : f32 to vector<1x128xf32>
    %93 = arith.select %87, %91, %92 : vector<1x128xi1>, vector<1x128xf32>
    %c0_80 = arith.constant 0 : index
    %c0_81 = arith.constant 0 : index
    %94 = vector.load %arg8[%c0_80, %c0_81] : memref<64x32xbf16, #tpu.memory_space<vmem>>, vector<64x32xbf16>
    %c0_82 = arith.constant 0 : index
    %c0_83 = arith.constant 0 : index
    %c0_84 = arith.constant 0 : index
    %95 = vector.load %arg2[%c0_82, %c0_83, %c0_84] : memref<2x32x128xbf16, #tpu.memory_space<vmem>>, vector<1x32x128xbf16>
    %96 = vector.shape_cast %95 : vector<1x32x128xbf16> to vector<32x128xbf16>
    %cst_85 = arith.constant dense<0.000000e+00> : vector<64x128xf32>
    %97 = tpu.matmul %94, %96, %cst_85 {dimension_numbers = #tpu.dot_dimension_numbers<[1], [0], [0], [1], [0, 0, 1, 1], [], []>} : vector<64x32xbf16>, vector<32x128xbf16>, vector<64x128xf32> -> vector<64x128xf32>
    %c0_86 = arith.constant 0 : index
    %c0_87 = arith.constant 0 : index
    %c0_88 = arith.constant 0 : index
    %98 = vector.load %arg4[%c0_86, %c0_87, %c0_88] : memref<2x1x128xf32, #tpu.memory_space<vmem>>, vector<1x1x128xf32>
    %99 = vector.shape_cast %98 : vector<1x1x128xf32> to vector<1x128xf32>
    %100 = vector.broadcast %99 : vector<1x128xf32> to vector<64x128xf32>
    %101 = arith.addf %97, %100 : vector<64x128xf32>
    %c0_89 = arith.constant 0 : index
    %c0_90 = arith.constant 0 : index
    %c0_91 = arith.constant 0 : index
    %102 = vector.load %arg3[%c0_89, %c0_90, %c0_91] : memref<2x32x128xbf16, #tpu.memory_space<vmem>>, vector<1x32x128xbf16>
    %103 = vector.shape_cast %102 : vector<1x32x128xbf16> to vector<32x128xbf16>
    %cst_92 = arith.constant 0.000000e+00 : f32
    %104 = vector.broadcast %cst_92 : f32 to vector<8x32xf32>
    %105 = vector.extract_strided_slice %101 {offsets = [0, 0], sizes = [8, 128], strides = [1, 1]} : vector<64x128xf32> to vector<8x128xf32>
    %106 = vector.broadcast %90 : vector<1x128xf32> to vector<8x128xf32>
    %107 = arith.mulf %105, %106 : vector<8x128xf32>
    %108 = math.tanh %107 : vector<8x128xf32>
    %109 = vector.broadcast %90 : vector<1x128xf32> to vector<8x128xf32>
    %110 = arith.mulf %108, %109 : vector<8x128xf32>
    %111 = vector.broadcast %93 : vector<1x128xf32> to vector<8x128xf32>
    %112 = arith.addf %110, %111 : vector<8x128xf32>
    %113 = vector.extract_strided_slice %112 {offsets = [0, 0], sizes = [8, 32], strides = [1, 1]} : vector<8x128xf32> to vector<8x32xf32>
    %114 = vector.extract_strided_slice %112 {offsets = [0, 32], sizes = [8, 32], strides = [1, 1]} : vector<8x128xf32> to vector<8x32xf32>
    %115 = vector.extract_strided_slice %112 {offsets = [0, 64], sizes = [8, 32], strides = [1, 1]} : vector<8x128xf32> to vector<8x32xf32>
    %116 = vector.extract_strided_slice %112 {offsets = [0, 96], sizes = [8, 32], strides = [1, 1]} : vector<8x128xf32> to vector<8x32xf32>
    %117 = arith.mulf %114, %104 : vector<8x32xf32>
    %118 = arith.mulf %113, %115 : vector<8x32xf32>
    %119 = arith.addf %117, %118 : vector<8x32xf32>
    %120 = math.tanh %119 : vector<8x32xf32>
    %121 = arith.mulf %116, %120 : vector<8x32xf32>
    %122 = arith.truncf %121 : vector<8x32xf32> to vector<8x32xbf16>
    %c0_93 = arith.constant 0 : index
    %c0_94 = arith.constant 0 : index
    %123 = vector.load %arg8[%c0_93, %c0_94] : memref<64x32xbf16, #tpu.memory_space<vmem>>, vector<8x32xbf16>
    tpu.vector_store %arg8[%c0_93, %c0_94], %122 {strides = array<i32>} : memref<64x32xbf16, #tpu.memory_space<vmem>>, vector<8x32xbf16>,
    %124 = vector.extract_strided_slice %101 {offsets = [8, 0], sizes = [8, 128], strides = [1, 1]} : vector<64x128xf32> to vector<8x128xf32>
    %cst_95 = arith.constant dense<0.000000e+00> : vector<8x128xf32>
    %125 = tpu.matmul %122, %103, %cst_95 {dimension_numbers = #tpu.dot_dimension_numbers<[1], [0], [0], [1], [0, 0, 1, 1], [], []>} : vector<8x32xbf16>, vector<32x128xbf16>, vector<8x128xf32> -> vector<8x128xf32>
    %126 = arith.addf %124, %125 : vector<8x128xf32>
    %127 = vector.broadcast %90 : vector<1x128xf32> to vector<8x128xf32>
    %128 = arith.mulf %126, %127 : vector<8x128xf32>
    %129 = math.tanh %128 : vector<8x128xf32>
    %130 = vector.broadcast %90 : vector<1x128xf32> to vector<8x128xf32>
    %131 = arith.mulf %129, %130 : vector<8x128xf32>
    %132 = vector.broadcast %93 : vector<1x128xf32> to vector<8x128xf32>
    %133 = arith.addf %131, %132 : vector<8x128xf32>
    %134 = vector.extract_strided_slice %133 {offsets = [0, 0], sizes = [8, 32], strides = [1, 1]} : vector<8x128xf32> to vector<8x32xf32>
    %135 = vector.extract_strided_slice %133 {offsets = [0, 32], sizes = [8, 32], strides = [1, 1]} : vector<8x128xf32> to vector<8x32xf32>
    %136 = vector.extract_strided_slice %133 {offsets = [0, 64], sizes = [8, 32], strides = [1, 1]} : vector<8x128xf32> to vector<8x32xf32>
    %137 = vector.extract_strided_slice %133 {offsets = [0, 96], sizes = [8, 32], strides = [1, 1]} : vector<8x128xf32> to vector<8x32xf32>
    %138 = arith.mulf %135, %119 : vector<8x32xf32>
    %139 = arith.mulf %134, %136 : vector<8x32xf32>
    %140 = arith.addf %138, %139 : vector<8x32xf32>
    %141 = math.tanh %140 : vector<8x32xf32>
    %142 = arith.mulf %137, %141 : vector<8x32xf32>
    %143 = arith.truncf %142 : vector<8x32xf32> to vector<8x32xbf16>
    %c8_96 = arith.constant 8 : index
    %c0_97 = arith.constant 0 : index
    %144 = vector.load %arg8[%c8_96, %c0_97] : memref<64x32xbf16, #tpu.memory_space<vmem>>, vector<8x32xbf16>
    tpu.vector_store %arg8[%c8_96, %c0_97], %143 {strides = array<i32>} : memref<64x32xbf16, #tpu.memory_space<vmem>>, vector<8x32xbf16>,
    %145 = vector.extract_strided_slice %101 {offsets = [16, 0], sizes = [8, 128], strides = [1, 1]} : vector<64x128xf32> to vector<8x128xf32>
    %cst_98 = arith.constant dense<0.000000e+00> : vector<8x128xf32>
    %146 = tpu.matmul %143, %103, %cst_98 {dimension_numbers = #tpu.dot_dimension_numbers<[1], [0], [0], [1], [0, 0, 1, 1], [], []>} : vector<8x32xbf16>, vector<32x128xbf16>, vector<8x128xf32> -> vector<8x128xf32>
    %147 = arith.addf %145, %146 : vector<8x128xf32>
    %148 = vector.broadcast %90 : vector<1x128xf32> to vector<8x128xf32>
    %149 = arith.mulf %147, %148 : vector<8x128xf32>
    %150 = math.tanh %149 : vector<8x128xf32>
    %151 = vector.broadcast %90 : vector<1x128xf32> to vector<8x128xf32>
    %152 = arith.mulf %150, %151 : vector<8x128xf32>
    %153 = vector.broadcast %93 : vector<1x128xf32> to vector<8x128xf32>
    %154 = arith.addf %152, %153 : vector<8x128xf32>
    %155 = vector.extract_strided_slice %154 {offsets = [0, 0], sizes = [8, 32], strides = [1, 1]} : vector<8x128xf32> to vector<8x32xf32>
    %156 = vector.extract_strided_slice %154 {offsets = [0, 32], sizes = [8, 32], strides = [1, 1]} : vector<8x128xf32> to vector<8x32xf32>
    %157 = vector.extract_strided_slice %154 {offsets = [0, 64], sizes = [8, 32], strides = [1, 1]} : vector<8x128xf32> to vector<8x32xf32>
    %158 = vector.extract_strided_slice %154 {offsets = [0, 96], sizes = [8, 32], strides = [1, 1]} : vector<8x128xf32> to vector<8x32xf32>
    %159 = arith.mulf %156, %140 : vector<8x32xf32>
    %160 = arith.mulf %155, %157 : vector<8x32xf32>
    %161 = arith.addf %159, %160 : vector<8x32xf32>
    %162 = math.tanh %161 : vector<8x32xf32>
    %163 = arith.mulf %158, %162 : vector<8x32xf32>
    %164 = arith.truncf %163 : vector<8x32xf32> to vector<8x32xbf16>
    %c16_99 = arith.constant 16 : index
    %c0_100 = arith.constant 0 : index
    %165 = vector.load %arg8[%c16_99, %c0_100] : memref<64x32xbf16, #tpu.memory_space<vmem>>, vector<8x32xbf16>
    tpu.vector_store %arg8[%c16_99, %c0_100], %164 {strides = array<i32>} : memref<64x32xbf16, #tpu.memory_space<vmem>>, vector<8x32xbf16>,
    %166 = vector.extract_strided_slice %101 {offsets = [24, 0], sizes = [8, 128], strides = [1, 1]} : vector<64x128xf32> to vector<8x128xf32>
    %cst_101 = arith.constant dense<0.000000e+00> : vector<8x128xf32>
    %167 = tpu.matmul %164, %103, %cst_101 {dimension_numbers = #tpu.dot_dimension_numbers<[1], [0], [0], [1], [0, 0, 1, 1], [], []>} : vector<8x32xbf16>, vector<32x128xbf16>, vector<8x128xf32> -> vector<8x128xf32>
    %168 = arith.addf %166, %167 : vector<8x128xf32>
    %169 = vector.broadcast %90 : vector<1x128xf32> to vector<8x128xf32>
    %170 = arith.mulf %168, %169 : vector<8x128xf32>
    %171 = math.tanh %170 : vector<8x128xf32>
    %172 = vector.broadcast %90 : vector<1x128xf32> to vector<8x128xf32>
    %173 = arith.mulf %171, %172 : vector<8x128xf32>
    %174 = vector.broadcast %93 : vector<1x128xf32> to vector<8x128xf32>
    %175 = arith.addf %173, %174 : vector<8x128xf32>
    %176 = vector.extract_strided_slice %175 {offsets = [0, 0], sizes = [8, 32], strides = [1, 1]} : vector<8x128xf32> to vector<8x32xf32>
    %177 = vector.extract_strided_slice %175 {offsets = [0, 32], sizes = [8, 32], strides = [1, 1]} : vector<8x128xf32> to vector<8x32xf32>
    %178 = vector.extract_strided_slice %175 {offsets = [0, 64], sizes = [8, 32], strides = [1, 1]} : vector<8x128xf32> to vector<8x32xf32>
    %179 = vector.extract_strided_slice %175 {offsets = [0, 96], sizes = [8, 32], strides = [1, 1]} : vector<8x128xf32> to vector<8x32xf32>
    %180 = arith.mulf %177, %161 : vector<8x32xf32>
    %181 = arith.mulf %176, %178 : vector<8x32xf32>
    %182 = arith.addf %180, %181 : vector<8x32xf32>
    %183 = math.tanh %182 : vector<8x32xf32>
    %184 = arith.mulf %179, %183 : vector<8x32xf32>
    %185 = arith.truncf %184 : vector<8x32xf32> to vector<8x32xbf16>
    %c24_102 = arith.constant 24 : index
    %c0_103 = arith.constant 0 : index
    %186 = vector.load %arg8[%c24_102, %c0_103] : memref<64x32xbf16, #tpu.memory_space<vmem>>, vector<8x32xbf16>
    tpu.vector_store %arg8[%c24_102, %c0_103], %185 {strides = array<i32>} : memref<64x32xbf16, #tpu.memory_space<vmem>>, vector<8x32xbf16>,
    %187 = vector.extract_strided_slice %101 {offsets = [32, 0], sizes = [8, 128], strides = [1, 1]} : vector<64x128xf32> to vector<8x128xf32>
    %cst_104 = arith.constant dense<0.000000e+00> : vector<8x128xf32>
    %188 = tpu.matmul %185, %103, %cst_104 {dimension_numbers = #tpu.dot_dimension_numbers<[1], [0], [0], [1], [0, 0, 1, 1], [], []>} : vector<8x32xbf16>, vector<32x128xbf16>, vector<8x128xf32> -> vector<8x128xf32>
    %189 = arith.addf %187, %188 : vector<8x128xf32>
    %190 = vector.broadcast %90 : vector<1x128xf32> to vector<8x128xf32>
    %191 = arith.mulf %189, %190 : vector<8x128xf32>
    %192 = math.tanh %191 : vector<8x128xf32>
    %193 = vector.broadcast %90 : vector<1x128xf32> to vector<8x128xf32>
    %194 = arith.mulf %192, %193 : vector<8x128xf32>
    %195 = vector.broadcast %93 : vector<1x128xf32> to vector<8x128xf32>
    %196 = arith.addf %194, %195 : vector<8x128xf32>
    %197 = vector.extract_strided_slice %196 {offsets = [0, 0], sizes = [8, 32], strides = [1, 1]} : vector<8x128xf32> to vector<8x32xf32>
    %198 = vector.extract_strided_slice %196 {offsets = [0, 32], sizes = [8, 32], strides = [1, 1]} : vector<8x128xf32> to vector<8x32xf32>
    %199 = vector.extract_strided_slice %196 {offsets = [0, 64], sizes = [8, 32], strides = [1, 1]} : vector<8x128xf32> to vector<8x32xf32>
    %200 = vector.extract_strided_slice %196 {offsets = [0, 96], sizes = [8, 32], strides = [1, 1]} : vector<8x128xf32> to vector<8x32xf32>
    %201 = arith.mulf %198, %182 : vector<8x32xf32>
    %202 = arith.mulf %197, %199 : vector<8x32xf32>
    %203 = arith.addf %201, %202 : vector<8x32xf32>
    %204 = math.tanh %203 : vector<8x32xf32>
    %205 = arith.mulf %200, %204 : vector<8x32xf32>
    %206 = arith.truncf %205 : vector<8x32xf32> to vector<8x32xbf16>
    %c32_105 = arith.constant 32 : index
    %c0_106 = arith.constant 0 : index
    %207 = vector.load %arg8[%c32_105, %c0_106] : memref<64x32xbf16, #tpu.memory_space<vmem>>, vector<8x32xbf16>
    tpu.vector_store %arg8[%c32_105, %c0_106], %206 {strides = array<i32>} : memref<64x32xbf16, #tpu.memory_space<vmem>>, vector<8x32xbf16>,
    %208 = vector.extract_strided_slice %101 {offsets = [40, 0], sizes = [8, 128], strides = [1, 1]} : vector<64x128xf32> to vector<8x128xf32>
    %cst_107 = arith.constant dense<0.000000e+00> : vector<8x128xf32>
    %209 = tpu.matmul %206, %103, %cst_107 {dimension_numbers = #tpu.dot_dimension_numbers<[1], [0], [0], [1], [0, 0, 1, 1], [], []>} : vector<8x32xbf16>, vector<32x128xbf16>, vector<8x128xf32> -> vector<8x128xf32>
    %210 = arith.addf %208, %209 : vector<8x128xf32>
    %211 = vector.broadcast %90 : vector<1x128xf32> to vector<8x128xf32>
    %212 = arith.mulf %210, %211 : vector<8x128xf32>
    %213 = math.tanh %212 : vector<8x128xf32>
    %214 = vector.broadcast %90 : vector<1x128xf32> to vector<8x128xf32>
    %215 = arith.mulf %213, %214 : vector<8x128xf32>
    %216 = vector.broadcast %93 : vector<1x128xf32> to vector<8x128xf32>
    %217 = arith.addf %215, %216 : vector<8x128xf32>
    %218 = vector.extract_strided_slice %217 {offsets = [0, 0], sizes = [8, 32], strides = [1, 1]} : vector<8x128xf32> to vector<8x32xf32>
    %219 = vector.extract_strided_slice %217 {offsets = [0, 32], sizes = [8, 32], strides = [1, 1]} : vector<8x128xf32> to vector<8x32xf32>
    %220 = vector.extract_strided_slice %217 {offsets = [0, 64], sizes = [8, 32], strides = [1, 1]} : vector<8x128xf32> to vector<8x32xf32>
    %221 = vector.extract_strided_slice %217 {offsets = [0, 96], sizes = [8, 32], strides = [1, 1]} : vector<8x128xf32> to vector<8x32xf32>
    %222 = arith.mulf %219, %203 : vector<8x32xf32>
    %223 = arith.mulf %218, %220 : vector<8x32xf32>
    %224 = arith.addf %222, %223 : vector<8x32xf32>
    %225 = math.tanh %224 : vector<8x32xf32>
    %226 = arith.mulf %221, %225 : vector<8x32xf32>
    %227 = arith.truncf %226 : vector<8x32xf32> to vector<8x32xbf16>
    %c40_108 = arith.constant 40 : index
    %c0_109 = arith.constant 0 : index
    %228 = vector.load %arg8[%c40_108, %c0_109] : memref<64x32xbf16, #tpu.memory_space<vmem>>, vector<8x32xbf16>
    tpu.vector_store %arg8[%c40_108, %c0_109], %227 {strides = array<i32>} : memref<64x32xbf16, #tpu.memory_space<vmem>>, vector<8x32xbf16>,
    %229 = vector.extract_strided_slice %101 {offsets = [48, 0], sizes = [8, 128], strides = [1, 1]} : vector<64x128xf32> to vector<8x128xf32>
    %cst_110 = arith.constant dense<0.000000e+00> : vector<8x128xf32>
    %230 = tpu.matmul %227, %103, %cst_110 {dimension_numbers = #tpu.dot_dimension_numbers<[1], [0], [0], [1], [0, 0, 1, 1], [], []>} : vector<8x32xbf16>, vector<32x128xbf16>, vector<8x128xf32> -> vector<8x128xf32>
    %231 = arith.addf %229, %230 : vector<8x128xf32>
    %232 = vector.broadcast %90 : vector<1x128xf32> to vector<8x128xf32>
    %233 = arith.mulf %231, %232 : vector<8x128xf32>
    %234 = math.tanh %233 : vector<8x128xf32>
    %235 = vector.broadcast %90 : vector<1x128xf32> to vector<8x128xf32>
    %236 = arith.mulf %234, %235 : vector<8x128xf32>
    %237 = vector.broadcast %93 : vector<1x128xf32> to vector<8x128xf32>
    %238 = arith.addf %236, %237 : vector<8x128xf32>
    %239 = vector.extract_strided_slice %238 {offsets = [0, 0], sizes = [8, 32], strides = [1, 1]} : vector<8x128xf32> to vector<8x32xf32>
    %240 = vector.extract_strided_slice %238 {offsets = [0, 32], sizes = [8, 32], strides = [1, 1]} : vector<8x128xf32> to vector<8x32xf32>
    %241 = vector.extract_strided_slice %238 {offsets = [0, 64], sizes = [8, 32], strides = [1, 1]} : vector<8x128xf32> to vector<8x32xf32>
    %242 = vector.extract_strided_slice %238 {offsets = [0, 96], sizes = [8, 32], strides = [1, 1]} : vector<8x128xf32> to vector<8x32xf32>
    %243 = arith.mulf %240, %224 : vector<8x32xf32>
    %244 = arith.mulf %239, %241 : vector<8x32xf32>
    %245 = arith.addf %243, %244 : vector<8x32xf32>
    %246 = math.tanh %245 : vector<8x32xf32>
    %247 = arith.mulf %242, %246 : vector<8x32xf32>
    %248 = arith.truncf %247 : vector<8x32xf32> to vector<8x32xbf16>
    %c48_111 = arith.constant 48 : index
    %c0_112 = arith.constant 0 : index
    %249 = vector.load %arg8[%c48_111, %c0_112] : memref<64x32xbf16, #tpu.memory_space<vmem>>, vector<8x32xbf16>
    tpu.vector_store %arg8[%c48_111, %c0_112], %248 {strides = array<i32>} : memref<64x32xbf16, #tpu.memory_space<vmem>>, vector<8x32xbf16>,
    %250 = vector.extract_strided_slice %101 {offsets = [56, 0], sizes = [8, 128], strides = [1, 1]} : vector<64x128xf32> to vector<8x128xf32>
    %cst_113 = arith.constant dense<0.000000e+00> : vector<8x128xf32>
    %251 = tpu.matmul %248, %103, %cst_113 {dimension_numbers = #tpu.dot_dimension_numbers<[1], [0], [0], [1], [0, 0, 1, 1], [], []>} : vector<8x32xbf16>, vector<32x128xbf16>, vector<8x128xf32> -> vector<8x128xf32>
    %252 = arith.addf %250, %251 : vector<8x128xf32>
    %253 = vector.broadcast %90 : vector<1x128xf32> to vector<8x128xf32>
    %254 = arith.mulf %252, %253 : vector<8x128xf32>
    %255 = math.tanh %254 : vector<8x128xf32>
    %256 = vector.broadcast %90 : vector<1x128xf32> to vector<8x128xf32>
    %257 = arith.mulf %255, %256 : vector<8x128xf32>
    %258 = vector.broadcast %93 : vector<1x128xf32> to vector<8x128xf32>
    %259 = arith.addf %257, %258 : vector<8x128xf32>
    %260 = vector.extract_strided_slice %259 {offsets = [0, 0], sizes = [8, 32], strides = [1, 1]} : vector<8x128xf32> to vector<8x32xf32>
    %261 = vector.extract_strided_slice %259 {offsets = [0, 32], sizes = [8, 32], strides = [1, 1]} : vector<8x128xf32> to vector<8x32xf32>
    %262 = vector.extract_strided_slice %259 {offsets = [0, 64], sizes = [8, 32], strides = [1, 1]} : vector<8x128xf32> to vector<8x32xf32>
    %263 = vector.extract_strided_slice %259 {offsets = [0, 96], sizes = [8, 32], strides = [1, 1]} : vector<8x128xf32> to vector<8x32xf32>
    %264 = arith.mulf %261, %245 : vector<8x32xf32>
    %265 = arith.mulf %260, %262 : vector<8x32xf32>
    %266 = arith.addf %264, %265 : vector<8x32xf32>
    %267 = math.tanh %266 : vector<8x32xf32>
    %268 = arith.mulf %263, %267 : vector<8x32xf32>
    %269 = arith.truncf %268 : vector<8x32xf32> to vector<8x32xbf16>
    %c56_114 = arith.constant 56 : index
    %c0_115 = arith.constant 0 : index
    %270 = vector.load %arg8[%c56_114, %c0_115] : memref<64x32xbf16, #tpu.memory_space<vmem>>, vector<8x32xbf16>
    tpu.vector_store %arg8[%c56_114, %c0_115], %269 {strides = array<i32>} : memref<64x32xbf16, #tpu.memory_space<vmem>>, vector<8x32xbf16>,
    %c0_116 = arith.constant 0 : index
    %c0_117 = arith.constant 0 : index
    %271 = vector.load %arg8[%c0_116, %c0_117] : memref<64x32xbf16, #tpu.memory_space<vmem>>, vector<64x32xbf16>
    %c1_118 = arith.constant 1 : index
    %c0_119 = arith.constant 0 : index
    %c0_120 = arith.constant 0 : index
    %272 = vector.load %arg2[%c1_118, %c0_119, %c0_120] : memref<2x32x128xbf16, #tpu.memory_space<vmem>>, vector<1x32x128xbf16>
    %273 = vector.shape_cast %272 : vector<1x32x128xbf16> to vector<32x128xbf16>
    %cst_121 = arith.constant dense<0.000000e+00> : vector<64x128xf32>
    %274 = tpu.matmul %271, %273, %cst_121 {dimension_numbers = #tpu.dot_dimension_numbers<[1], [0], [0], [1], [0, 0, 1, 1], [], []>} : vector<64x32xbf16>, vector<32x128xbf16>, vector<64x128xf32> -> vector<64x128xf32>
    %c1_122 = arith.constant 1 : index
    %c0_123 = arith.constant 0 : index
    %c0_124 = arith.constant 0 : index
    %275 = vector.load %arg4[%c1_122, %c0_123, %c0_124] : memref<2x1x128xf32, #tpu.memory_space<vmem>>, vector<1x1x128xf32>
    %276 = vector.shape_cast %275 : vector<1x1x128xf32> to vector<1x128xf32>
    %277 = vector.broadcast %276 : vector<1x128xf32> to vector<64x128xf32>
    %278 = arith.addf %274, %277 : vector<64x128xf32>
    %c1_125 = arith.constant 1 : index
    %c0_126 = arith.constant 0 : index
    %c0_127 = arith.constant 0 : index
    %279 = vector.load %arg3[%c1_125, %c0_126, %c0_127] : memref<2x32x128xbf16, #tpu.memory_space<vmem>>, vector<1x32x128xbf16>
    %280 = vector.shape_cast %279 : vector<1x32x128xbf16> to vector<32x128xbf16>
    %cst_128 = arith.constant 0.000000e+00 : f32
    %281 = vector.broadcast %cst_128 : f32 to vector<8x32xf32>
    %282 = vector.extract_strided_slice %278 {offsets = [0, 0], sizes = [8, 128], strides = [1, 1]} : vector<64x128xf32> to vector<8x128xf32>
    %283 = vector.broadcast %90 : vector<1x128xf32> to vector<8x128xf32>
    %284 = arith.mulf %282, %283 : vector<8x128xf32>
    %285 = math.tanh %284 : vector<8x128xf32>
    %286 = vector.broadcast %90 : vector<1x128xf32> to vector<8x128xf32>
    %287 = arith.mulf %285, %286 : vector<8x128xf32>
    %288 = vector.broadcast %93 : vector<1x128xf32> to vector<8x128xf32>
    %289 = arith.addf %287, %288 : vector<8x128xf32>
    %290 = vector.extract_strided_slice %289 {offsets = [0, 0], sizes = [8, 32], strides = [1, 1]} : vector<8x128xf32> to vector<8x32xf32>
    %291 = vector.extract_strided_slice %289 {offsets = [0, 32], sizes = [8, 32], strides = [1, 1]} : vector<8x128xf32> to vector<8x32xf32>
    %292 = vector.extract_strided_slice %289 {offsets = [0, 64], sizes = [8, 32], strides = [1, 1]} : vector<8x128xf32> to vector<8x32xf32>
    %293 = vector.extract_strided_slice %289 {offsets = [0, 96], sizes = [8, 32], strides = [1, 1]} : vector<8x128xf32> to vector<8x32xf32>
    %294 = arith.mulf %291, %281 : vector<8x32xf32>
    %295 = arith.mulf %290, %292 : vector<8x32xf32>
    %296 = arith.addf %294, %295 : vector<8x32xf32>
    %297 = math.tanh %296 : vector<8x32xf32>
    %298 = arith.mulf %293, %297 : vector<8x32xf32>
    %299 = arith.truncf %298 : vector<8x32xf32> to vector<8x32xbf16>
    %300 = vector.extract_strided_slice %278 {offsets = [8, 0], sizes = [8, 128], strides = [1, 1]} : vector<64x128xf32> to vector<8x128xf32>
    %cst_129 = arith.constant dense<0.000000e+00> : vector<8x128xf32>
    %301 = tpu.matmul %299, %280, %cst_129 {dimension_numbers = #tpu.dot_dimension_numbers<[1], [0], [0], [1], [0, 0, 1, 1], [], []>} : vector<8x32xbf16>, vector<32x128xbf16>, vector<8x128xf32> -> vector<8x128xf32>
    %302 = arith.addf %300, %301 : vector<8x128xf32>
    %303 = vector.broadcast %90 : vector<1x128xf32> to vector<8x128xf32>
    %304 = arith.mulf %302, %303 : vector<8x128xf32>
    %305 = math.tanh %304 : vector<8x128xf32>
    %306 = vector.broadcast %90 : vector<1x128xf32> to vector<8x128xf32>
    %307 = arith.mulf %305, %306 : vector<8x128xf32>
    %308 = vector.broadcast %93 : vector<1x128xf32> to vector<8x128xf32>
    %309 = arith.addf %307, %308 : vector<8x128xf32>
    %310 = vector.extract_strided_slice %309 {offsets = [0, 0], sizes = [8, 32], strides = [1, 1]} : vector<8x128xf32> to vector<8x32xf32>
    %311 = vector.extract_strided_slice %309 {offsets = [0, 32], sizes = [8, 32], strides = [1, 1]} : vector<8x128xf32> to vector<8x32xf32>
    %312 = vector.extract_strided_slice %309 {offsets = [0, 64], sizes = [8, 32], strides = [1, 1]} : vector<8x128xf32> to vector<8x32xf32>
    %313 = vector.extract_strided_slice %309 {offsets = [0, 96], sizes = [8, 32], strides = [1, 1]} : vector<8x128xf32> to vector<8x32xf32>
    %314 = arith.mulf %311, %296 : vector<8x32xf32>
    %315 = arith.mulf %310, %312 : vector<8x32xf32>
    %316 = arith.addf %314, %315 : vector<8x32xf32>
    %317 = math.tanh %316 : vector<8x32xf32>
    %318 = arith.mulf %313, %317 : vector<8x32xf32>
    %319 = arith.truncf %318 : vector<8x32xf32> to vector<8x32xbf16>
    %320 = vector.extract_strided_slice %278 {offsets = [16, 0], sizes = [8, 128], strides = [1, 1]} : vector<64x128xf32> to vector<8x128xf32>
    %cst_130 = arith.constant dense<0.000000e+00> : vector<8x128xf32>
    %321 = tpu.matmul %319, %280, %cst_130 {dimension_numbers = #tpu.dot_dimension_numbers<[1], [0], [0], [1], [0, 0, 1, 1], [], []>} : vector<8x32xbf16>, vector<32x128xbf16>, vector<8x128xf32> -> vector<8x128xf32>
    %322 = arith.addf %320, %321 : vector<8x128xf32>
    %323 = vector.broadcast %90 : vector<1x128xf32> to vector<8x128xf32>
    %324 = arith.mulf %322, %323 : vector<8x128xf32>
    %325 = math.tanh %324 : vector<8x128xf32>
    %326 = vector.broadcast %90 : vector<1x128xf32> to vector<8x128xf32>
    %327 = arith.mulf %325, %326 : vector<8x128xf32>
    %328 = vector.broadcast %93 : vector<1x128xf32> to vector<8x128xf32>
    %329 = arith.addf %327, %328 : vector<8x128xf32>
    %330 = vector.extract_strided_slice %329 {offsets = [0, 0], sizes = [8, 32], strides = [1, 1]} : vector<8x128xf32> to vector<8x32xf32>
    %331 = vector.extract_strided_slice %329 {offsets = [0, 32], sizes = [8, 32], strides = [1, 1]} : vector<8x128xf32> to vector<8x32xf32>
    %332 = vector.extract_strided_slice %329 {offsets = [0, 64], sizes = [8, 32], strides = [1, 1]} : vector<8x128xf32> to vector<8x32xf32>
    %333 = vector.extract_strided_slice %329 {offsets = [0, 96], sizes = [8, 32], strides = [1, 1]} : vector<8x128xf32> to vector<8x32xf32>
    %334 = arith.mulf %331, %316 : vector<8x32xf32>
    %335 = arith.mulf %330, %332 : vector<8x32xf32>
    %336 = arith.addf %334, %335 : vector<8x32xf32>
    %337 = math.tanh %336 : vector<8x32xf32>
    %338 = arith.mulf %333, %337 : vector<8x32xf32>
    %339 = arith.truncf %338 : vector<8x32xf32> to vector<8x32xbf16>
    %340 = vector.extract_strided_slice %278 {offsets = [24, 0], sizes = [8, 128], strides = [1, 1]} : vector<64x128xf32> to vector<8x128xf32>
    %cst_131 = arith.constant dense<0.000000e+00> : vector<8x128xf32>
    %341 = tpu.matmul %339, %280, %cst_131 {dimension_numbers = #tpu.dot_dimension_numbers<[1], [0], [0], [1], [0, 0, 1, 1], [], []>} : vector<8x32xbf16>, vector<32x128xbf16>, vector<8x128xf32> -> vector<8x128xf32>
    %342 = arith.addf %340, %341 : vector<8x128xf32>
    %343 = vector.broadcast %90 : vector<1x128xf32> to vector<8x128xf32>
    %344 = arith.mulf %342, %343 : vector<8x128xf32>
    %345 = math.tanh %344 : vector<8x128xf32>
    %346 = vector.broadcast %90 : vector<1x128xf32> to vector<8x128xf32>
    %347 = arith.mulf %345, %346 : vector<8x128xf32>
    %348 = vector.broadcast %93 : vector<1x128xf32> to vector<8x128xf32>
    %349 = arith.addf %347, %348 : vector<8x128xf32>
    %350 = vector.extract_strided_slice %349 {offsets = [0, 0], sizes = [8, 32], strides = [1, 1]} : vector<8x128xf32> to vector<8x32xf32>
    %351 = vector.extract_strided_slice %349 {offsets = [0, 32], sizes = [8, 32], strides = [1, 1]} : vector<8x128xf32> to vector<8x32xf32>
    %352 = vector.extract_strided_slice %349 {offsets = [0, 64], sizes = [8, 32], strides = [1, 1]} : vector<8x128xf32> to vector<8x32xf32>
    %353 = vector.extract_strided_slice %349 {offsets = [0, 96], sizes = [8, 32], strides = [1, 1]} : vector<8x128xf32> to vector<8x32xf32>
    %354 = arith.mulf %351, %336 : vector<8x32xf32>
    %355 = arith.mulf %350, %352 : vector<8x32xf32>
    %356 = arith.addf %354, %355 : vector<8x32xf32>
    %357 = math.tanh %356 : vector<8x32xf32>
    %358 = arith.mulf %353, %357 : vector<8x32xf32>
    %359 = arith.truncf %358 : vector<8x32xf32> to vector<8x32xbf16>
    %360 = vector.extract_strided_slice %278 {offsets = [32, 0], sizes = [8, 128], strides = [1, 1]} : vector<64x128xf32> to vector<8x128xf32>
    %cst_132 = arith.constant dense<0.000000e+00> : vector<8x128xf32>
    %361 = tpu.matmul %359, %280, %cst_132 {dimension_numbers = #tpu.dot_dimension_numbers<[1], [0], [0], [1], [0, 0, 1, 1], [], []>} : vector<8x32xbf16>, vector<32x128xbf16>, vector<8x128xf32> -> vector<8x128xf32>
    %362 = arith.addf %360, %361 : vector<8x128xf32>
    %363 = vector.broadcast %90 : vector<1x128xf32> to vector<8x128xf32>
    %364 = arith.mulf %362, %363 : vector<8x128xf32>
    %365 = math.tanh %364 : vector<8x128xf32>
    %366 = vector.broadcast %90 : vector<1x128xf32> to vector<8x128xf32>
    %367 = arith.mulf %365, %366 : vector<8x128xf32>
    %368 = vector.broadcast %93 : vector<1x128xf32> to vector<8x128xf32>
    %369 = arith.addf %367, %368 : vector<8x128xf32>
    %370 = vector.extract_strided_slice %369 {offsets = [0, 0], sizes = [8, 32], strides = [1, 1]} : vector<8x128xf32> to vector<8x32xf32>
    %371 = vector.extract_strided_slice %369 {offsets = [0, 32], sizes = [8, 32], strides = [1, 1]} : vector<8x128xf32> to vector<8x32xf32>
    %372 = vector.extract_strided_slice %369 {offsets = [0, 64], sizes = [8, 32], strides = [1, 1]} : vector<8x128xf32> to vector<8x32xf32>
    %373 = vector.extract_strided_slice %369 {offsets = [0, 96], sizes = [8, 32], strides = [1, 1]} : vector<8x128xf32> to vector<8x32xf32>
    %374 = arith.mulf %371, %356 : vector<8x32xf32>
    %375 = arith.mulf %370, %372 : vector<8x32xf32>
    %376 = arith.addf %374, %375 : vector<8x32xf32>
    %377 = math.tanh %376 : vector<8x32xf32>
    %378 = arith.mulf %373, %377 : vector<8x32xf32>
    %379 = arith.truncf %378 : vector<8x32xf32> to vector<8x32xbf16>
    %380 = vector.extract_strided_slice %278 {offsets = [40, 0], sizes = [8, 128], strides = [1, 1]} : vector<64x128xf32> to vector<8x128xf32>
    %cst_133 = arith.constant dense<0.000000e+00> : vector<8x128xf32>
    %381 = tpu.matmul %379, %280, %cst_133 {dimension_numbers = #tpu.dot_dimension_numbers<[1], [0], [0], [1], [0, 0, 1, 1], [], []>} : vector<8x32xbf16>, vector<32x128xbf16>, vector<8x128xf32> -> vector<8x128xf32>
    %382 = arith.addf %380, %381 : vector<8x128xf32>
    %383 = vector.broadcast %90 : vector<1x128xf32> to vector<8x128xf32>
    %384 = arith.mulf %382, %383 : vector<8x128xf32>
    %385 = math.tanh %384 : vector<8x128xf32>
    %386 = vector.broadcast %90 : vector<1x128xf32> to vector<8x128xf32>
    %387 = arith.mulf %385, %386 : vector<8x128xf32>
    %388 = vector.broadcast %93 : vector<1x128xf32> to vector<8x128xf32>
    %389 = arith.addf %387, %388 : vector<8x128xf32>
    %390 = vector.extract_strided_slice %389 {offsets = [0, 0], sizes = [8, 32], strides = [1, 1]} : vector<8x128xf32> to vector<8x32xf32>
    %391 = vector.extract_strided_slice %389 {offsets = [0, 32], sizes = [8, 32], strides = [1, 1]} : vector<8x128xf32> to vector<8x32xf32>
    %392 = vector.extract_strided_slice %389 {offsets = [0, 64], sizes = [8, 32], strides = [1, 1]} : vector<8x128xf32> to vector<8x32xf32>
    %393 = vector.extract_strided_slice %389 {offsets = [0, 96], sizes = [8, 32], strides = [1, 1]} : vector<8x128xf32> to vector<8x32xf32>
    %394 = arith.mulf %391, %376 : vector<8x32xf32>
    %395 = arith.mulf %390, %392 : vector<8x32xf32>
    %396 = arith.addf %394, %395 : vector<8x32xf32>
    %397 = math.tanh %396 : vector<8x32xf32>
    %398 = arith.mulf %393, %397 : vector<8x32xf32>
    %399 = arith.truncf %398 : vector<8x32xf32> to vector<8x32xbf16>
    %400 = vector.extract_strided_slice %278 {offsets = [48, 0], sizes = [8, 128], strides = [1, 1]} : vector<64x128xf32> to vector<8x128xf32>
    %cst_134 = arith.constant dense<0.000000e+00> : vector<8x128xf32>
    %401 = tpu.matmul %399, %280, %cst_134 {dimension_numbers = #tpu.dot_dimension_numbers<[1], [0], [0], [1], [0, 0, 1, 1], [], []>} : vector<8x32xbf16>, vector<32x128xbf16>, vector<8x128xf32> -> vector<8x128xf32>
    %402 = arith.addf %400, %401 : vector<8x128xf32>
    %403 = vector.broadcast %90 : vector<1x128xf32> to vector<8x128xf32>
    %404 = arith.mulf %402, %403 : vector<8x128xf32>
    %405 = math.tanh %404 : vector<8x128xf32>
    %406 = vector.broadcast %90 : vector<1x128xf32> to vector<8x128xf32>
    %407 = arith.mulf %405, %406 : vector<8x128xf32>
    %408 = vector.broadcast %93 : vector<1x128xf32> to vector<8x128xf32>
    %409 = arith.addf %407, %408 : vector<8x128xf32>
    %410 = vector.extract_strided_slice %409 {offsets = [0, 0], sizes = [8, 32], strides = [1, 1]} : vector<8x128xf32> to vector<8x32xf32>
    %411 = vector.extract_strided_slice %409 {offsets = [0, 32], sizes = [8, 32], strides = [1, 1]} : vector<8x128xf32> to vector<8x32xf32>
    %412 = vector.extract_strided_slice %409 {offsets = [0, 64], sizes = [8, 32], strides = [1, 1]} : vector<8x128xf32> to vector<8x32xf32>
    %413 = vector.extract_strided_slice %409 {offsets = [0, 96], sizes = [8, 32], strides = [1, 1]} : vector<8x128xf32> to vector<8x32xf32>
    %414 = arith.mulf %411, %396 : vector<8x32xf32>
    %415 = arith.mulf %410, %412 : vector<8x32xf32>
    %416 = arith.addf %414, %415 : vector<8x32xf32>
    %417 = math.tanh %416 : vector<8x32xf32>
    %418 = arith.mulf %413, %417 : vector<8x32xf32>
    %419 = arith.truncf %418 : vector<8x32xf32> to vector<8x32xbf16>
    %420 = vector.extract_strided_slice %278 {offsets = [56, 0], sizes = [8, 128], strides = [1, 1]} : vector<64x128xf32> to vector<8x128xf32>
    %cst_135 = arith.constant dense<0.000000e+00> : vector<8x128xf32>
    %421 = tpu.matmul %419, %280, %cst_135 {dimension_numbers = #tpu.dot_dimension_numbers<[1], [0], [0], [1], [0, 0, 1, 1], [], []>} : vector<8x32xbf16>, vector<32x128xbf16>, vector<8x128xf32> -> vector<8x128xf32>
    %422 = arith.addf %420, %421 : vector<8x128xf32>
    %423 = vector.broadcast %90 : vector<1x128xf32> to vector<8x128xf32>
    %424 = arith.mulf %422, %423 : vector<8x128xf32>
    %425 = math.tanh %424 : vector<8x128xf32>
    %426 = vector.broadcast %90 : vector<1x128xf32> to vector<8x128xf32>
    %427 = arith.mulf %425, %426 : vector<8x128xf32>
    %428 = vector.broadcast %93 : vector<1x128xf32> to vector<8x128xf32>
    %429 = arith.addf %427, %428 : vector<8x128xf32>
    %430 = vector.extract_strided_slice %429 {offsets = [0, 0], sizes = [8, 32], strides = [1, 1]} : vector<8x128xf32> to vector<8x32xf32>
    %431 = vector.extract_strided_slice %429 {offsets = [0, 32], sizes = [8, 32], strides = [1, 1]} : vector<8x128xf32> to vector<8x32xf32>
    %432 = vector.extract_strided_slice %429 {offsets = [0, 64], sizes = [8, 32], strides = [1, 1]} : vector<8x128xf32> to vector<8x32xf32>
    %433 = vector.extract_strided_slice %429 {offsets = [0, 96], sizes = [8, 32], strides = [1, 1]} : vector<8x128xf32> to vector<8x32xf32>
    %434 = arith.mulf %431, %416 : vector<8x32xf32>
    %435 = arith.mulf %430, %432 : vector<8x32xf32>
    %436 = arith.addf %434, %435 : vector<8x32xf32>
    %437 = math.tanh %436 : vector<8x32xf32>
    %438 = arith.mulf %433, %437 : vector<8x32xf32>
    %439 = arith.truncf %438 : vector<8x32xf32> to vector<8x32xbf16>
    %c0_136 = arith.constant 0 : index
    %c0_137 = arith.constant 0 : index
    %440 = vector.load %arg5[%c0_136, %c0_137] : memref<32x128xbf16, #tpu.memory_space<vmem>>, vector<32x128xbf16>
    %cst_138 = arith.constant dense<0.000000e+00> : vector<8x128xf32>
    %441 = tpu.matmul %439, %440, %cst_138 {dimension_numbers = #tpu.dot_dimension_numbers<[1], [0], [0], [1], [0, 0, 1, 1], [], []>} : vector<8x32xbf16>, vector<32x128xbf16>, vector<8x128xf32> -> vector<8x128xf32>
    %c0_139 = arith.constant 0 : index
    %c0_140 = arith.constant 0 : index
    %442 = vector.load %arg6[%c0_139, %c0_140] : memref<1x128xf32, #tpu.memory_space<vmem>>, vector<1x128xf32>
    %443 = vector.broadcast %442 : vector<1x128xf32> to vector<8x128xf32>
    %444 = arith.addf %441, %443 : vector<8x128xf32>
    %c0_141 = arith.constant 0 : index
    %c0_142 = arith.constant 0 : index
    %445 = vector.load %arg7[%c0_141, %c0_142] : memref<8x128xf32, #tpu.memory_space<vmem>>, vector<8x128xf32>
    tpu.vector_store %arg7[%c0_141, %c0_142], %444 {strides = array<i32>} : memref<8x128xf32, #tpu.memory_space<vmem>>, vector<8x128xf32>,
    return
  }
}

</mosaic_0001>

<bundles_post_ra>
// kernel: model_forward.1
= control target key start
LH: loop header
LB: loop body
LE: loop exit
PB: predicated region body
PF: predicated region fallthrough
CT: control target
= control target key end

     0   :  { %12 = vsyncpa [#allocation4], 0  ;;  %s2683_s0 = inlined_call_operand.vmem [shape: s32[8,2], index: 0, kind: input, shape index: {}]   ;;  %s2684_s1 = inlined_call_operand.vmem [shape: bf16[50,1,32], index: 1, kind: input, shape index: {}]   ;;  %s2685_s2 = inlined_call_operand.vmem [shape: bf16[2,32,128], index: 2, kind: input, shape index: {}]   ;;  %s2686_s3 = inlined_call_operand.vmem [shape: bf16[2,32,128], index: 3, kind: input, shape index: {}]   ;;  %s2687_s4 = inlined_call_operand.vmem [shape: f32[2,1,128], index: 4, kind: input, shape index: {}]   ;;  %s2688_s5 = inlined_call_operand.vmem [shape: bf16[32,128], index: 5, kind: input, shape index: {}]   ;;  %s2689_s6 = inlined_call_operand.vmem [shape: f32[1,128], index: 6, kind: input, shape index: {}]   ;;  %s2690_s7 = inlined_call_operand.vmem [shape: f32[8,128], index: 7, kind: output, shape index: {}]  }
   0x1   :  { %s19_s26 = sshll.u32 %s2683_s0, 4  ;;  %s20_s26 = int_to_ptr.vmem [resolvable:$true] %s19_s26 }
   0x2   :  { %s2112_s27 = scalar_lea.vmem %s20_s26, 128  ;;  %p2117_p1 = scmp.lt.s32.totalorder %s20_s26, %s20_s26 }
   0x3   :  { %p2113_p0 = scmp.ne.s32.totalorder %s20_s26, %s2112_s27  ;;  %p2118_p2 = scmp.lt.s32.totalorder %s2112_s27, %s2112_s27 }
   0x5   :  { %p2119_p3 = por %p2118_p2, %p2117_p1 }
   0x7   :  { %p2120_p4 = pnand %p2119_p3, %p2113_p0 }
   0x9   :  { %2123 = shalt.err (!%p2120_p4)
}
   0xa   :  { %s2126_s28 = smov [#allocation3]  }
   0xb   :  { %22 = dma.vmem_to_smem %s20_s26, 128, %s2126_s28, [#allocation4]  }
   0xc   :  { %2124 = dma.done.wait [#allocation4], 128  }
   0xd   :  { %2125 = vsyncadd [#allocation4], 4294967168 }
   0xe   :  { %38 = sfence }
   0xf   :  { %v2038_v0 = vld [vmem:[%s2685_s2] sm:$0xff]   ;;  %vm40_vm0 = vcmask 261120   ;;  %v68_v1 = vlaneseq  ;;  %v2039_v2 = vld [vmem:[%s2685_s2 + $0x8] sm:$0xff]   ;;  %v2127_v3 = vmov 0   ;;  %s45_s9 = sld [smem:[#allocation3]]  ;;  %s1757_s10 = sld [smem:[#allocation3 + $0x1]] }
  0x10   :  { %1886 = vmatprep.subr.bf16.mxu0 %v2038_v0  ;;  %41 = vst.msk [vmem:[#allocation2] sm:$0xff] %vm40_vm0, %v2127_v3  ;;  %42 = vst.msk [vmem:[#allocation2 + $0x8] sm:$0xff] %vm40_vm0, %v2127_v3  ;;  %vm49_vm1 = vsmask.f32 256  ;;  %vm48_vm2 = vcmask 253952   ;;  %s1759_s11 = sld [smem:[#allocation3 + $0x80]] }
  0x11   :  { %43 = vst.msk [vmem:[#allocation2 + $0x10] sm:$0xff] %vm40_vm0, %v2127_v3  ;;  %44 = vst.msk [vmem:[#allocation2 + $0x18] sm:$0xff] %vm40_vm0, %v2127_v3  ;;  %1887 = vmatpush3.bf16.msra.mxu0 %v2038_v0  ;;  %v2128_v4 = vmov 1966171168   ;;  %v69_v6 = vshrl.u32 %v68_v1, 7  ;;  %vm101_vm4 = vcmask 258052  }
  0x12   :  { %1888 = vmatprep.subr.bf16.mxu0 %v2039_v2  ;;  %v66_v5 = vunpack.c.l.s4 %v2128_v4  ;;  %vm76_vm3 = vsmask.f32 7938  ;;  %s1761_s12 = sld [smem:[#allocation3 + $0x81]]  ;;  %s1763_s13 = sld [smem:[#allocation3 + $0x100]]  ;;  %vm2194_vm5 = vmand %vm48_vm2, %vm49_vm1  ;;  %vm102_vm6 = vsmask.f32 4352 }
  0x13   :  { %s2188_s14 = sld [smem:[#allocation3 + $0x101]]  ;;  %s2190_s15 = sld [smem:[#allocation3 + $0x180]]  ;;  %vm130_vm7 = vsmask.f32 7954  ;;  %vm2231_vm8 = vmand %vm101_vm4, %vm102_vm6  ;;  %v376_v53 = vand.u32 127, %v68_v1  ;;  %v2129_v56 = vmov 0.5  }
  0x14   :  { %v67_v7 = vunpack.c.0.s8 %v66_v5  ;;  %s2198_s16 = sld [smem:[#allocation3 + $0x181]]  ;;  %vm2245_vm9 = vmand %vm48_vm2, %vm76_vm3  ;;  %v2275_v54 = vld [vmem:[%s2687_s4] ss:$0 sm:$0xff]  ;;  %s2131_s20 = smov 32   ;;  %vm2133_vm14 = vmmov 0   ;;  %vm516_vm15 = vcmask 257024  }
  0x15   :  { %1889 = vmatpush3.bf16.msra.mxu0 %v2039_v2  ;;  %s46_s19 = scalar_lea.vmem %s2684_s1, %s45_s9  ;;  %s55_s22 = scalar_lea.vmem %s2684_s1, %s1757_s10  ;;  %vm2259_vm10 = vmand %vm101_vm4, %vm130_vm7  ;;  %vm377_vm11 = vcmp.ge.s32.totalorder %v376_v53, 64  ;;  %vm378_vm12 = vcmp.lt.s32.totalorder %v376_v53, 96  ;;  %vm601_vm1 = vcmask 261124  }
  0x16   :  { %v2203_v9 = vsub.s32 %v67_v7, %v69_v6  ;;  %v47_v10 = vld [vmem:[%s46_s19] sm:$0x1]  ;;  %s82_s25 = scalar_lea.vmem %s2684_s1, %s1759_s11  ;;  %vm379_vm13 = vmand %vm377_vm11, %vm378_vm12  ;;  %s2130_s19 = smov 64  }
  0x17   :  { %v51_v11 = vld [vmem:[#allocation2] sm:$0x1]  ;;  %v1758_v13 = vld.sshfl [vmem:[%s55_s22] sm:$0x1 pattern:$0x75316420] }
  0x18   :  { %v52_v12 = vsel %vm2194_vm5, %v47_v10, %v51_v11  ;;  %v138_v14 = vld [vmem:[#allocation2 + $0x8] sm:$0x1]  ;;  %v71_v15 = vrot.slane %v1758_v13, %v2203_v9  ;;  %v1760_v16 = vld.sshfl [vmem:[%s82_s25] sm:$0x1 pattern:$0x75316420]  ;;  %s108_s28 = scalar_lea.vmem %s2684_s1, %s1761_s12  ;;  %s136_s0 = scalar_lea.vmem %s2684_s1, %s1763_s13 }
  0x19   :  { %53 = vst [vmem:[#allocation2] sm:$0x1] %v52_v12  ;;  %v98_v17 = vrot.slane %v1760_v16, %v2203_v9  ;;  %v1762_v18 = vld.sshfl [vmem:[%s108_s28] sm:$0x1 pattern:$0x75316420]  ;;  %s142_s10 = scalar_lea.vmem %s2684_s1, %s2188_s14  ;;  %s167_s18 = scalar_lea.vmem %s2684_s1, %s2190_s15 }
  0x1a   :  { %v137_v19 = vld [vmem:[%s136_s0] sm:$0x1]  ;;  %v104_v21 = vld [vmem:[#allocation2] sm:$0x10]  ;;  %v124_v22 = vrot.slane %v1762_v18, %v2203_v9  ;;  %s190_s14 = scalar_lea.vmem %s2684_s1, %s2198_s16  ;;  %v73_v28 = vshll.u32 %v71_v15, 16  ;;  %v2279_v57 = vsel %vm379_vm13, 1.0, %v2129_v56 }
  0x1b   :  { %v139_v23 = vsel %vm2194_vm5, %v137_v19, %v138_v14  ;;  %v1765_v24 = vld.sshfl [vmem:[%s142_s10] sm:$0x1 pattern:$0x75316420]  ;;  %v99_v25 = vcombine.low %v98_v17, %v98_v17  ;;  %v186_v33 = vld [vmem:[#allocation2 + $0x8] sm:$0x10] }
  0x1c   :  { %140 = vst [vmem:[#allocation2 + $0x8] sm:$0x1] %v139_v23  ;;  %v158_v26 = vrot.slane %v1765_v24, %v2203_v9  ;;  %v1767_v27 = vld.sshfl [vmem:[%s167_s18] sm:$0x1 pattern:$0x75316420] }
  0x1d   :  { %v183_v30 = vrot.slane %v1767_v27, %v2203_v9  ;;  %v1769_v31 = vld.sshfl [vmem:[%s190_s14] sm:$0x1 pattern:$0x75316420]  ;;  %v105_v32 = vsel %vm2231_vm8, %v99_v25, %v104_v21  ;;  %v126_v35 = vshll.u32 %v124_v22, 16  ;;  %v2285_v0 = vsel %vm379_vm13, 0.0, %v2129_v56 }
  0x1e   :  { %v206_v34 = vrot.slane %v1769_v31, %v2203_v9  ;;  %106 = vst [vmem:[#allocation2] sm:$0x10] %v105_v32  ;;  %v160_v38 = vshll.u32 %v158_v26, 16  ;;  %v2294_v10 = vld [vmem:[%s2686_s3] sm:$0xff]   ;;  %v2132_v11 = vmov 0.0   ;;  %v2303_v12 = vld [vmem:[%s2686_s3 + $0x8] sm:$0xff]  }
  0x1f   :  { %v184_v36 = vcombine.low %v183_v30, %v183_v30  ;;  %v128_v42 = vrot.slane %v126_v35, 4  ;;  %1898 = vmatprep.subr.bf16.mxu1 %v2132_v11  ;;  %1902 = vmatprep.mubr.msk.bf16.mxu1 %vm2133_vm14, %v2132_v11  ;;  %s1770_s25 = sld [smem:[#allocation3 + $0x200]]  ;;  %s1771_s26 = sld [smem:[#allocation3 + $0x201]] }
  0x20   :  { %v78_v37 = vld [vmem:[#allocation2] sm:$0x1]  ;;  %v208_v41 = vshll.u32 %v206_v34, 16  ;;  %1899 = vmatpush3.bf16.msra.mxu1 %v2294_v10  ;;  %1914 = vmatprep.subr.bf16.mxu0 %v2132_v11  ;;  %s1773_s27 = sld [smem:[#allocation3 + $0x280]]  ;;  %s1775_s28 = sld [smem:[#allocation3 + $0x281]] }
  0x21   :  { %v79_v39 = vsel %vm2245_vm9, %v73_v28, %v78_v37  ;;  %v187_v40 = vsel %vm2231_vm8, %v184_v36, %v186_v33  ;;  %1900 = vmatprep.subr.bf16.mxu1 %v2132_v11  ;;  %s1777_s29 = sld [smem:[#allocation3 + $0x300]]  ;;  %s1778_s30 = sld [smem:[#allocation3 + $0x301]] }
  0x22   :  { %80 = vst [vmem:[#allocation2] sm:$0x1] %v79_v39  ;;  %188 = vst [vmem:[#allocation2 + $0x8] sm:$0x10] %v187_v40  ;;  %v210_v47 = vrot.slane %v208_v41, 4  ;;  %s2356_s0 = sld [smem:[#allocation3 + $0x380]] }
  0x23   :  { %v163_v43 = vld [vmem:[#allocation2 + $0x8] sm:$0x1]  ;;  %s2358_s8 = sld [smem:[#allocation3 + $0x381]] }
  0x24   :  { %v164_v45 = vsel %vm2245_vm9, %v160_v38, %v163_v43  ;;  %1901 = vmatpush3.bf16.msra.mxu1 %v2303_v12 }
  0x25   :  { %165 = vst [vmem:[#allocation2 + $0x8] sm:$0x1] %v164_v45  ;;  %v132_v46 = vld [vmem:[#allocation2] sm:$0x10]  ;;  %1906 = vmatprep.subr.bf16.mxu1 %v2132_v11  ;;  %s216_s11 = scalar_lea.vmem %s2684_s1, %s1770_s25  ;;  %s222_s12 = scalar_lea.vmem %s2684_s1, %s1771_s26 }
  0x26   :  { %v133_v48 = vsel %vm2259_vm10, %v128_v42, %v132_v46  ;;  %s247_s15 = scalar_lea.vmem %s2684_s1, %s1773_s27  ;;  %s270_s22 = scalar_lea.vmem %s2684_s1, %s1775_s28 }
  0x27   :  { %134 = vst [vmem:[#allocation2] sm:$0x10] %v133_v48  ;;  %s296_s25 = scalar_lea.vmem %s2684_s1, %s1777_s29  ;;  %s302_s10 = scalar_lea.vmem %s2684_s1, %s1778_s30 }
  0x29   :  { %v212_v49 = vld [vmem:[#allocation2 + $0x8] sm:$0x10]  ;;  %s350_s29 = scalar_lea.vmem %s2684_s1, %s2358_s8 }
  0x2a   :  { %v213_v50 = vsel %vm2259_vm10, %v210_v47, %v212_v49 }
  0x2b   :  { %214 = vst [vmem:[#allocation2 + $0x8] sm:$0x10] %v213_v50 }
  0x2e   :  { %v382_v51 = vld [vmem:[#allocation2] sm:$0xff] }
  0x2f   :  { %1890 = vmatprep.mubr.msk.bf16.mxu0 %vm40_vm0, %v382_v51 }
  0x32   :  { %v383_v52 = vld [vmem:[#allocation2 + $0x8] sm:$0xff] }
  0x33   :  { %1891 = vmatmul.mubr.msk.bf16.vlgmr.msra.gmra.mrb[0].mxu0 %vm40_vm0, %v383_v52 }
  0x34   :  { %1915 = vmatpush3.bf16.msra.mxu0 %v2294_v10 }
  0x35   :  { %1916 = vmatprep.subr.bf16.mxu0 %v2132_v11 }
  0x38   :  { %1917 = vmatpush3.bf16.msra.mxu0 %v2303_v12 }
  0x39   :  { %1930 = vmatprep.subr.bf16.mxu0 %v2132_v11 }
 0x106   :  { %v2277_v55 = vpop.f32.mrb[0].mxu0 }
 0x107   :  { %v455_v58 = vpop.f32.mrb[1].mxu0  ;;  %v464_v40 = vadd.f32 %v2277_v55, %v2275_v54 }
 0x108   :  { %v456_v59 = vadd.f32 %v2275_v54, %v455_v58  ;;  %v2282_v60 = vpop.f32.mrb[2].mxu0  ;;  %v218_v58 = vld [vmem:[#allocation2 + $0x10] sm:$0x1] }
 0x109   :  { %v458_v61 = vpop.f32.mrb[3].mxu0 }
 0x10a   :  { %v490_v62 = vmul.f32 %v456_v59, %v2279_v57  ;;  %v459_v18 = vadd.f32 %v2275_v54, %v458_v61  ;;  %v298_v59 = vld [vmem:[#allocation2 + $0x18] sm:$0x1]  ;;  %v217_v61 = vld [vmem:[%s216_s11] sm:$0x1]  ;;  %s327_s11 = scalar_lea.vmem %s2684_s1, %s2356_s0 }
 0x10c   :  { %2048 = vtanh.f32 %v490_v62  ;;  %v1772_v62 = vld.sshfl [vmem:[%s222_s12] sm:$0x1 pattern:$0x75316420] }
 0x116   :  { %v2049_v63 = vpop.eup %2048 }
 0x117   :  { %v492_v1 = vmul.f32 %v2049_v63, %v2279_v57 }
 0x119   :  { %v493_v2 = vadd.f32 %v492_v1, %v2285_v0  ;;  %v219_v1 = vsel %vm2194_vm5, %v217_v61, %v218_v58 }
 0x11a   :  { %220 = vst [vmem:[#allocation2 + $0x10] sm:$0x1] %v219_v1 }
 0x11b   :  { %496 = vrot.lane.b32.xlu0 %v493_v2, %s2130_s19  ;;  %v494_v5 = vmul.f32 0.0, %v493_v2 }
 0x18d   :  { %v497_v3 = vpop.permute.xlu0 %496 }
 0x18e   :  { %v499_v4 = vmul.f32 %v497_v3, %v493_v2  ;;  %v238_v3 = vrot.slane %v1772_v62, %v2203_v9 }
 0x190   :  { %501 = vrot.lane.b32.xlu0 %v499_v4, %s2131_s20 }
 0x202   :  { %v502_v6 = vpop.permute.xlu0 %501 }
 0x203   :  { %v504_v7 = vadd.f32 %v502_v6, %v494_v5  ;;  %v1776_v5 = vld.sshfl [vmem:[%s270_s22] sm:$0x1 pattern:$0x75316420] }
 0x204   :  { %v297_v6 = vld [vmem:[%s296_s25] sm:$0x1] }
 0x205   :  { %2050 = vtanh.f32 %v504_v7 }
 0x20f   :  { %v2051_v13 = vpop.eup %2050 }
 0x210   :  { %507 = vrot.lane.b32.xlu1 %v2051_v13, %s2130_s19  ;;  %v286_v13 = vrot.slane %v1776_v5, %v2203_v9 }
 0x282   :  { %v508_v14 = vpop.permute.xlu1 %507 }
 0x283   :  { %v510_v15 = vmul.f32 %v508_v14, %v493_v2  ;;  %v1774_v2 = vld.sshfl [vmem:[%s247_s15] sm:$0x1 pattern:$0x75316420]  ;;  %v299_v14 = vsel %vm2194_vm5, %v297_v6, %v298_v59 }
 0x284   :  { %v263_v4 = vrot.slane %v1774_v2, %v2203_v9  ;;  %300 = vst [vmem:[#allocation2 + $0x18] sm:$0x1] %v299_v14 }
 0x285   :  { %v511_v16 = vpack.c.bf16 %v510_v15, %v510_v15  ;;  %v1779_v15 = vld.sshfl [vmem:[%s302_s10] sm:$0x1 pattern:$0x75316420] }
 0x287   :  { %513 = vrot.lane.b32.xlu1 %v511_v16, %s2131_s20  ;;  %v264_v16 = vcombine.low %v263_v4, %v263_v4 }
 0x2f9   :  { %v514_v17 = vpop.permute.xlu1 %513 }
 0x2fa   :  { %517 = vst.msk [vmem:[#allocation2] sm:$0xf] %vm516_vm15, %v514_v17  ;;  %1903 = vmatmul.mubr.msk.bf16.vlgmr.msra.gmra.mrb[0].mxu1 %vm40_vm0, %v514_v17  ;;  %v318_v17 = vrot.slane %v1779_v15, %v2203_v9 }
 0x2fb   :  { %1907 = vmatpush3.bf16.msra.mxu1 %v2294_v10  ;;  %1910 = vmatprep.mubr.msk.bf16.mxu1 %vm2133_vm14, %v2132_v11 }
 0x2fc   :  { %1908 = vmatprep.subr.bf16.mxu1 %v2132_v11 }
 0x2ff   :  { %1909 = vmatpush3.bf16.msra.mxu1 %v2303_v12 }
 0x300   :  { %1922 = vmatprep.subr.bf16.mxu1 %v2132_v11 }
 0x3cd   :  { %v567_v19 = vpop.f32.mrb[0].mxu1 }
 0x3ce   :  { %v573_v21 = vadd.f32 %v567_v19, %v459_v18  ;;  %v1904_v22 = vpop.f32.mrb[1].mxu1  ;;  %v1781_v18 = vld.sshfl [vmem:[%s327_s11] sm:$0x1 pattern:$0x75316420] }
 0x3cf   :  { %v570_v23 = vpop.f32.mrb[2].mxu1  ;;  %v343_v19 = vrot.slane %v1781_v18, %v2203_v9  ;;  %v240_v22 = vshll.u32 %v238_v3, 16 }
 0x3d0   :  { %v574_v24 = vmul.f32 %v573_v21, %v2279_v57  ;;  %v1905_v25 = vpop.f32.mrb[3].mxu1  ;;  %v1783_v21 = vld.sshfl [vmem:[%s350_s29] sm:$0x1 pattern:$0x75316420] }
 0x3d1   :  { %v366_v25 = vrot.slane %v1783_v21, %v2203_v9  ;;  %v344_v8 = vcombine.low %v343_v19, %v343_v19 }
 0x3d2   :  { %2052 = vtanh.f32 %v574_v24  ;;  %v346_v24 = vld [vmem:[#allocation2 + $0x18] sm:$0x10] }
 0x3dc   :  { %v2053_v26 = vpop.eup %2052 }
 0x3dd   :  { %v576_v27 = vmul.f32 %v2053_v26, %v2279_v57  ;;  %v288_v26 = vshll.u32 %v286_v13, 16 }
 0x3df   :  { %v577_v28 = vadd.f32 %v576_v27, %v2285_v0  ;;  %v320_v27 = vshll.u32 %v318_v17, 16 }
 0x3e1   :  { %580 = vrot.lane.b32.xlu0 %v577_v28, %s2130_s19  ;;  %v578_v32 = vmul.f32 %v577_v28, %v504_v7  ;;  %v266_v7 = vld [vmem:[#allocation2 + $0x10] sm:$0x10] }
 0x3e2   :  { %v267_v23 = vsel %vm2231_vm8, %v264_v16, %v266_v7 }
 0x3e3   :  { %268 = vst [vmem:[#allocation2 + $0x10] sm:$0x10] %v267_v23 }
 0x3ea   :  { %v292_v9 = vld [vmem:[#allocation2 + $0x10] sm:$0x10] }
 0x453   :  { %v581_v30 = vpop.permute.xlu0 %580 }
 0x454   :  { %v583_v31 = vmul.f32 %v581_v30, %v577_v28  ;;  %v347_v30 = vsel %vm2231_vm8, %v344_v8, %v346_v24 }
 0x455   :  { %348 = vst [vmem:[#allocation2 + $0x18] sm:$0x10] %v347_v30 }
 0x456   :  { %585 = vrot.lane.b32.xlu1 %v583_v31, %s2131_s20 }
 0x45c   :  { %v372_v20 = vld [vmem:[#allocation2 + $0x18] sm:$0x10] }
 0x4c8   :  { %v586_v33 = vpop.permute.xlu1 %585 }
 0x4c9   :  { %v588_v34 = vadd.f32 %v586_v33, %v578_v32  ;;  %v368_v32 = vshll.u32 %v366_v25, 16  ;;  %v290_v33 = vrot.slane %v288_v26, 4 }
 0x4cb   :  { %2054 = vtanh.f32 %v588_v34 }
 0x4d5   :  { %v2055_v35 = vpop.eup %2054 }
 0x4d6   :  { %591 = vrot.lane.b32.xlu0 %v2055_v35, %s2130_s19 }
 0x548   :  { %v592_v36 = vpop.permute.xlu0 %591 }
 0x549   :  { %v594_v37 = vmul.f32 %v592_v36, %v577_v28  ;;  %v243_v28 = vld [vmem:[#allocation2 + $0x10] sm:$0x1]  ;;  %v370_v36 = vrot.slane %v368_v32, 4 }
 0x54a   :  { %v244_v31 = vsel %vm2245_vm9, %v240_v22, %v243_v28 }
 0x54b   :  { %v2330_v38 = vpack.c.bf16 %v594_v37, %v594_v37  ;;  %245 = vst [vmem:[#allocation2 + $0x10] sm:$0x1] %v244_v31  ;;  %v293_v37 = vsel %vm2259_vm10, %v290_v33, %v292_v9 }
 0x54c   :  { %294 = vst [vmem:[#allocation2 + $0x10] sm:$0x10] %v293_v37 }
 0x54d   :  { %603 = vrot.lane.b32.xlu1 %v2330_v38, %s2131_s20 }
 0x5bf   :  { %v604_v39 = vpop.permute.xlu1 %603 }
 0x5c0   :  { %1911 = vmatmul.mubr.msk.bf16.vlgmr.msra.gmra.mrb[4].mxu1 %vm40_vm0, %v604_v39  ;;  %v373_v39 = vsel %vm2259_vm10, %v370_v36, %v372_v20 }
 0x5c1   :  { %1923 = vmatpush3.bf16.msra.mxu1 %v2294_v10  ;;  %1926 = vmatprep.mubr.msk.bf16.mxu1 %vm2133_vm14, %v2132_v11  ;;  %374 = vst [vmem:[#allocation2 + $0x18] sm:$0x10] %v373_v39 }
 0x5c2   :  { %1924 = vmatprep.subr.bf16.mxu1 %v2132_v11 }
 0x5c5   :  { %1925 = vmatpush3.bf16.msra.mxu1 %v2303_v12 }
 0x5c6   :  { %1938 = vmatprep.subr.bf16.mxu1 %v2132_v11 }
 0x693   :  { %v642_v41 = vpop.f32.mrb[4].mxu1 }
 0x694   :  { %v648_v42 = vadd.f32 %v642_v41, %v464_v40  ;;  %v1912_v43 = vpop.f32.mrb[5].mxu1  ;;  %v384_v40 = vld [vmem:[#allocation2 + $0x10] sm:$0xff] }
 0x695   :  { %v645_v45 = vpop.f32.mrb[6].mxu1  ;;  %1894 = vmatprep.mubr.msk.bf16.mxu0 %vm40_vm0, %v384_v40 }
 0x696   :  { %v649_v46 = vmul.f32 %v648_v42, %v2279_v57  ;;  %v1913_v47 = vpop.f32.mrb[7].mxu1 }
 0x698   :  { %2056 = vtanh.f32 %v649_v46 }
 0x6a2   :  { %v2057_v48 = vpop.eup %2056 }
 0x6a3   :  { %v651_v49 = vmul.f32 %v2057_v48, %v2279_v57 }
 0x6a5   :  { %v2346_v50 = vadd.f32 %v651_v49, %v2285_v0  ;;  %v467_v49 = vadd.f32 %v2282_v60, %v2275_v54 }
 0x6a7   :  { %655 = vrot.lane.b32.xlu0 %v2346_v50, %s2130_s19  ;;  %v653_v53 = vmul.f32 %v2346_v50, %v588_v34  ;;  %v323_v34 = vld [vmem:[#allocation2 + $0x18] sm:$0x1] }
 0x6a8   :  { %v324_v35 = vsel %vm2245_vm9, %v320_v27, %v323_v34 }
 0x6a9   :  { %325 = vst [vmem:[#allocation2 + $0x18] sm:$0x1] %v324_v35 }
 0x6b0   :  { %v385_v41 = vld [vmem:[#allocation2 + $0x18] sm:$0xff] }
 0x6b1   :  { %1895 = vmatmul.mubr.msk.bf16.gmra.mrb[4].mxu0 %vm40_vm0, %v385_v41 }
 0x6b2   :  { %1918 = vmatprep.mubr.msk.bf16.mxu0 %vm2133_vm14, %v2132_v11 }
 0x719   :  { %v656_v51 = vpop.permute.xlu0 %655 }
 0x71a   :  { %v658_v52 = vmul.f32 %v656_v51, %v2346_v50 }
 0x71c   :  { %660 = vrot.lane.b32.xlu1 %v658_v52, %s2131_s20 }
 0x784   :  { %v2420_v44 = vpop.f32.mrb[4].mxu0 }
 0x785   :  { %v471_v46 = vpop.f32.mrb[5].mxu0 }
 0x786   :  { %v2423_v47 = vpop.f32.mrb[6].mxu0 }
 0x787   :  { %v2425_v48 = vpop.f32.mrb[7].mxu0 }
 0x788   :  { %v475_v34 = vadd.f32 %v2275_v54, %v2425_v48 }
 0x78e   :  { %v661_v55 = vpop.permute.xlu1 %660 }
 0x78f   :  { %v2353_v56 = vadd.f32 %v661_v55, %v653_v53 }
 0x791   :  { %2058 = vtanh.f32 %v2353_v56 }
 0x79b   :  { %v2059_v63 = vpop.eup %2058 }
 0x79c   :  { %666 = vrot.lane.b32.xlu0 %v2059_v63, %s2130_s19 }
 0x80e   :  { %v667_v29 = vpop.permute.xlu0 %666 }
 0x80f   :  { %v669_v42 = vmul.f32 %v667_v29, %v2346_v50 }
 0x811   :  { %v670_v43 = vpack.c.bf16 %v669_v42, %v669_v42  ;;  %v597_v42 = vrot.slane %v2330_v38, 4 }
 0x813   :  { %672 = vrot.lane.b32.xlu1 %v670_v43, %s2131_s20 }
 0x885   :  { %v673_v45 = vpop.permute.xlu1 %672 }
 0x886   :  { %675 = vst.msk [vmem:[#allocation2 + $0x8] sm:$0xf] %vm516_vm15, %v673_v45  ;;  %1919 = vmatmul.mubr.msk.bf16.vlgmr.msra.gmra.mrb[8].mxu0 %vm40_vm0, %v673_v45 }
 0x887   :  { %1931 = vmatpush3.bf16.msra.mxu0 %v2294_v10  ;;  %1934 = vmatprep.mubr.msk.bf16.mxu0 %vm2133_vm14, %v2132_v11 }
 0x888   :  { %1932 = vmatprep.subr.bf16.mxu0 %v2132_v11 }
 0x88b   :  { %1933 = vmatpush3.bf16.msra.mxu0 %v2303_v12 }
 0x88c   :  { %1946 = vmatprep.subr.bf16.mxu0 %v2132_v11 }
 0x959   :  { %v713_v50 = vpop.f32.mrb[8].mxu0 }
 0x95a   :  { %v719_v51 = vadd.f32 %v713_v50, %v467_v49  ;;  %v1920_v52 = vpop.f32.mrb[9].mxu0  ;;  %v2042_v49 = vld [vmem:[%s2685_s2 + $0x10] sm:$0xff]  }
 0x95b   :  { %v716_v53 = vpop.f32.mrb[10].mxu0 }
 0x95c   :  { %v720_v55 = vmul.f32 %v719_v51, %v2279_v57  ;;  %v1921_v58 = vpop.f32.mrb[11].mxu0 }
 0x95d   :  { %v2043_v58 = vld [vmem:[%s2685_s2 + $0x18] sm:$0xff]  }
 0x95e   :  { %2060 = vtanh.f32 %v720_v55 }
 0x968   :  { %v2061_v59 = vpop.eup %2060 }
 0x969   :  { %v722_v61 = vmul.f32 %v2061_v59, %v2279_v57 }
 0x96b   :  { %v723_v62 = vadd.f32 %v722_v61, %v2285_v0 }
 0x96d   :  { %726 = vrot.lane.b32.xlu0 %v723_v62, %s2130_s19  ;;  %v724_v60 = vmul.f32 %v723_v62, %v2353_v56  ;;  %v472_v56 = vadd.f32 %v2275_v54, %v471_v46 }
 0x9df   :  { %v727_v63 = vpop.permute.xlu0 %726 }
 0x9e0   :  { %v729_v1 = vmul.f32 %v727_v63, %v723_v62  ;;  %v480_v63 = vadd.f32 %v2420_v44, %v2275_v54 }
 0x9e2   :  { %731 = vrot.lane.b32.xlu1 %v729_v1, %s2131_s20 }
 0xa54   :  { %v732_v2 = vpop.permute.xlu1 %731 }
 0xa55   :  { %v734_v3 = vadd.f32 %v732_v2, %v724_v60 }
 0xa57   :  { %2062 = vtanh.f32 %v734_v3 }
 0xa61   :  { %v2063_v4 = vpop.eup %2062 }
 0xa62   :  { %737 = vrot.lane.b32.xlu0 %v2063_v4, %s2130_s19 }
 0xad4   :  { %v738_v5 = vpop.permute.xlu0 %737 }
 0xad5   :  { %v740_v6 = vmul.f32 %v738_v5, %v723_v62 }
 0xad7   :  { %v2438_v7 = vpack.c.bf16 %v740_v6, %v740_v6  ;;  %v2498_v6 = vld [vmem:[%s2687_s4 + $0x1] ss:$0 sm:$0xff] }
 0xad9   :  { %748 = vrot.lane.b32.xlu1 %v2438_v7, %s2131_s20  ;;  %v743_v38 = vrot.slane %v2438_v7, 4 }
 0xb4b   :  { %v749_v13 = vpop.permute.xlu1 %748 }
 0xb4c   :  { %1927 = vmatmul.mubr.msk.bf16.vlgmr.msra.gmra.mrb[8].mxu1 %vm40_vm0, %v749_v13 }
 0xb4d   :  { %1939 = vmatpush3.bf16.msra.mxu1 %v2294_v10  ;;  %1942 = vmatprep.mubr.msk.bf16.mxu1 %vm2133_vm14, %v2132_v11 }
 0xb4e   :  { %1940 = vmatprep.subr.bf16.mxu1 %v2132_v11 }
 0xb51   :  { %1941 = vmatpush3.bf16.msra.mxu1 %v2303_v12 }
 0xb52   :  { %1954 = vmatprep.subr.bf16.mxu1 %v2042_v49 }
 0xc1f   :  { %v787_v14 = vpop.f32.mrb[8].mxu1 }
 0xc20   :  { %v793_v15 = vadd.f32 %v787_v14, %v472_v56  ;;  %v1928_v16 = vpop.f32.mrb[9].mxu1 }
 0xc21   :  { %v790_v17 = vpop.f32.mrb[10].mxu1 }
 0xc22   :  { %v794_v18 = vmul.f32 %v793_v15, %v2279_v57  ;;  %v1929_v19 = vpop.f32.mrb[11].mxu1 }
 0xc24   :  { %2064 = vtanh.f32 %v794_v18 }
 0xc2e   :  { %v2065_v21 = vpop.eup %2064 }
 0xc2f   :  { %v796_v22 = vmul.f32 %v2065_v21, %v2279_v57 }
 0xc31   :  { %v797_v23 = vadd.f32 %v796_v22, %v2285_v0 }
 0xc33   :  { %800 = vrot.lane.b32.xlu0 %v797_v23, %s2130_s19  ;;  %v798_v26 = vmul.f32 %v797_v23, %v734_v3 }
 0xca5   :  { %v801_v24 = vpop.permute.xlu0 %800 }
 0xca6   :  { %v803_v25 = vmul.f32 %v801_v24, %v797_v23 }
 0xca8   :  { %805 = vrot.lane.b32.xlu1 %v803_v25, %s2131_s20 }
 0xd1a   :  { %v806_v8 = vpop.permute.xlu1 %805 }
 0xd1b   :  { %v808_v27 = vadd.f32 %v806_v8, %v798_v26 }
 0xd1d   :  { %2066 = vtanh.f32 %v808_v27 }
 0xd27   :  { %v2067_v28 = vpop.eup %2066 }
 0xd28   :  { %811 = vrot.lane.b32.xlu0 %v2067_v28, %s2130_s19 }
 0xd9a   :  { %v812_v30 = vpop.permute.xlu0 %811 }
 0xd9b   :  { %v814_v31 = vmul.f32 %v812_v30, %v797_v23 }
 0xd9d   :  { %v815_v32 = vpack.c.bf16 %v814_v31, %v814_v31 }
 0xd9f   :  { %817 = vrot.lane.b32.xlu1 %v815_v32, %s2131_s20 }
 0xe11   :  { %v818_v33 = vpop.permute.xlu1 %817 }
 0xe12   :  { %820 = vst.msk [vmem:[#allocation2 + $0x10] sm:$0xf] %vm516_vm15, %v818_v33  ;;  %1935 = vmatmul.mubr.msk.bf16.vlgmr.msra.gmra.mrb[12].mxu0 %vm40_vm0, %v818_v33 }
 0xe13   :  { %1947 = vmatpush3.bf16.msra.mxu0 %v2294_v10  ;;  %1950 = vmatprep.mubr.msk.bf16.mxu0 %vm2133_vm14, %v2132_v11 }
 0xe14   :  { %1948 = vmatprep.subr.bf16.mxu0 %v2132_v11 }
 0xe17   :  { %1949 = vmatpush3.bf16.msra.mxu0 %v2303_v12 }
 0xe18   :  { %1966 = vmatprep.subr.bf16.mxu0 %v2132_v11 }
 0xee5   :  { %v858_v35 = vpop.f32.mrb[12].mxu0 }
 0xee6   :  { %v864_v9 = vadd.f32 %v858_v35, %v475_v34  ;;  %v1936_v36 = vpop.f32.mrb[13].mxu0  ;;  %v2524_v35 = vld [vmem:[%s2686_s3 + $0x10] sm:$0xff]  }
 0xee7   :  { %v861_v37 = vpop.f32.mrb[14].mxu0 }
 0xee8   :  { %v865_v20 = vmul.f32 %v864_v9, %v2279_v57  ;;  %v1937_v39 = vpop.f32.mrb[15].mxu0  ;;  %v2531_v9 = vld [vmem:[%s2686_s3 + $0x18] sm:$0xff]  }
 0xeea   :  { %2068 = vtanh.f32 %v865_v20 }
 0xef4   :  { %v2069_v10 = vpop.eup %2068 }
 0xef5   :  { %v867_v40 = vmul.f32 %v2069_v10, %v2279_v57 }
 0xef7   :  { %v868_v41 = vadd.f32 %v867_v40, %v2285_v0 }
 0xef9   :  { %871 = vrot.lane.b32.xlu0 %v868_v41, %s2130_s19  ;;  %v869_v43 = vmul.f32 %v868_v41, %v808_v27 }
 0xf6b   :  { %v872_v12 = vpop.permute.xlu0 %871 }
 0xf6c   :  { %v874_v29 = vmul.f32 %v872_v12, %v868_v41 }
 0xf6e   :  { %876 = vrot.lane.b32.xlu1 %v874_v29, %s2131_s20  ;;  %v483_v29 = vadd.f32 %v2423_v47, %v2275_v54 }
 0xf72   :  { %598 = vrot.lane.b32.xlu1 %v597_v42, %s2131_s20 }
 0xfe0   :  { %v877_v45 = vpop.permute.xlu1 %876 }
 0xfe1   :  { %v879_v46 = vadd.f32 %v877_v45, %v869_v43 }
 0xfe3   :  { %2070 = vtanh.f32 %v879_v46 }
 0xfe4   :  { %v599_v48 = vpop.permute.xlu1 %598 }
 0xfe5   :  { %602 = vst.msk [vmem:[#allocation2] sm:$0xf0] %vm601_vm1, %v599_v48 }
 0xfec   :  { %v1038_v61 = vld [vmem:[#allocation2] sm:$0xff] }
 0xfed   :  { %v2071_v50 = vpop.eup %2070 }
 0xfee   :  { %882 = vrot.lane.b32.xlu0 %v2071_v50, %s2130_s19 }
 0xff2   :  { %744 = vrot.lane.b32.xlu0 %v743_v38, %s2131_s20 }
0x1060   :  { %v883_v51 = vpop.permute.xlu0 %882 }
0x1061   :  { %v885_v52 = vmul.f32 %v883_v51, %v868_v41 }
0x1063   :  { %v2480_v53 = vpack.c.bf16 %v885_v52, %v885_v52 }
0x1064   :  { %v745_v55 = vpop.permute.xlu0 %744 }
0x1065   :  { %747 = vst.msk [vmem:[#allocation2 + $0x8] sm:$0xf0] %vm601_vm1, %v745_v55  ;;  %893 = vrot.lane.b32.xlu1 %v2480_v53, %s2131_s20 }
0x106c   :  { %v1039_v62 = vld [vmem:[#allocation2 + $0x8] sm:$0xff] }
0x10d7   :  { %v894_v59 = vpop.permute.xlu1 %893 }
0x10d8   :  { %1943 = vmatmul.mubr.msk.bf16.vlgmr.msra.gmra.mrb[12].mxu1 %vm40_vm0, %v894_v59 }
0x10d9   :  { %1955 = vmatpush3.bf16.msra.mxu1 %v2042_v49  ;;  %1958 = vmatprep.mubr.msk.bf16.mxu1 %vm40_vm0, %v1038_v61 }
0x10da   :  { %1956 = vmatprep.subr.bf16.mxu1 %v2043_v58 }
0x10dd   :  { %1957 = vmatpush3.bf16.msra.mxu1 %v2043_v58 }
0x10de   :  { %1982 = vmatprep.subr.bf16.mxu1 %v2132_v11 }
0x10e0   :  { %1959 = vmatmul.mubr.msk.bf16.vlgmr.msra.gmra.mrb[16].mxu1 %vm40_vm0, %v1039_v62 }
0x10e1   :  { %1983 = vmatpush3.bf16.msra.mxu1 %v2524_v35 }
0x10e2   :  { %1984 = vmatprep.subr.bf16.mxu1 %v2132_v11 }
0x10e5   :  { %1985 = vmatpush3.bf16.msra.mxu1 %v2531_v9 }
0x10e6   :  { %1998 = vmatprep.subr.bf16.mxu1 %v2132_v11 }
0x11ab   :  { %v932_v1 = vpop.f32.mrb[12].mxu1 }
0x11ac   :  { %v938_v60 = vadd.f32 %v932_v1, %v480_v63  ;;  %v1944_v2 = vpop.f32.mrb[13].mxu1 }
0x11ad   :  { %v935_v3 = vpop.f32.mrb[14].mxu1 }
0x11ae   :  { %v939_v4 = vmul.f32 %v938_v60, %v2279_v57  ;;  %v1945_v5 = vpop.f32.mrb[15].mxu1 }
0x11b0   :  { %2072 = vtanh.f32 %v939_v4 }
0x11b3   :  { %v2500_v7 = vpop.f32.mrb[16].mxu1 }
0x11b4   :  { %v1113_v13 = vpop.f32.mrb[17].mxu1 }
0x11b5   :  { %v1114_v56 = vadd.f32 %v2498_v6, %v1113_v13  ;;  %v2503_v14 = vpop.f32.mrb[18].mxu1 }
0x11b6   :  { %v2505_v44 = vpop.f32.mrb[19].mxu1 }
0x11b7   :  { %v1149_v15 = vmul.f32 %v1114_v56, %v2279_v57  ;;  %v1117_v49 = vadd.f32 %v2498_v6, %v2505_v44 }
0x11b9   :  { %2074 = vtanh.f32 %v1149_v15 }
0x11ba   :  { %v2073_v16 = vpop.eup %2072 }
0x11bb   :  { %v941_v17 = vmul.f32 %v2073_v16, %v2279_v57 }
0x11bd   :  { %v942_v18 = vadd.f32 %v941_v17, %v2285_v0 }
0x11bf   :  { %945 = vrot.lane.b32.xlu0 %v942_v18, %s2130_s19  ;;  %v943_v8 = vmul.f32 %v942_v18, %v879_v46 }
0x11c3   :  { %v2075_v19 = vpop.eup %2074 }
0x11c4   :  { %v1151_v21 = vmul.f32 %v2075_v19, %v2279_v57 }
0x11c6   :  { %v1152_v22 = vadd.f32 %v1151_v21, %v2285_v0 }
0x11c8   :  { %1155 = vrot.lane.b32.xlu1 %v1152_v22, %s2130_s19  ;;  %v1153_v30 = vmul.f32 0.0, %v1152_v22 }
0x1231   :  { %v946_v23 = vpop.permute.xlu0 %945 }
0x1232   :  { %v948_v24 = vmul.f32 %v946_v23, %v942_v18 }
0x1234   :  { %950 = vrot.lane.b32.xlu0 %v948_v24, %s2131_s20  ;;  %v888_v24 = vrot.slane %v2480_v53, 4 }
0x123a   :  { %v1156_v25 = vpop.permute.xlu1 %1155 }
0x123b   :  { %v1158_v26 = vmul.f32 %v1156_v25, %v1152_v22 }
0x123d   :  { %1160 = vrot.lane.b32.xlu1 %v1158_v26, %s2131_s20 }
0x12a6   :  { %v951_v27 = vpop.permute.xlu0 %950 }
0x12a7   :  { %v2516_v28 = vadd.f32 %v951_v27, %v943_v8  ;;  %v1122_v27 = vadd.f32 %v2500_v7, %v2498_v6 }
0x12a9   :  { %2076 = vtanh.f32 %v2516_v28 }
0x12af   :  { %v1161_v31 = vpop.permute.xlu1 %1160 }
0x12b0   :  { %v1163_v32 = vadd.f32 %v1161_v31, %v1153_v30 }
0x12b2   :  { %2078 = vtanh.f32 %v1163_v32 }
0x12b3   :  { %v2077_v33 = vpop.eup %2076 }
0x12b4   :  { %956 = vrot.lane.b32.xlu0 %v2077_v33, %s2130_s19 }
0x12bc   :  { %v2079_v34 = vpop.eup %2078 }
0x12bd   :  { %1166 = vrot.lane.b32.xlu1 %v2079_v34, %s2130_s19 }
0x1326   :  { %v957_v36 = vpop.permute.xlu0 %956 }
0x1327   :  { %v959_v37 = vmul.f32 %v957_v36, %v942_v18 }
0x1329   :  { %v960_v20 = vpack.c.bf16 %v959_v37, %v959_v37 }
0x132b   :  { %962 = vrot.lane.b32.xlu0 %v960_v20, %s2131_s20 }
0x132f   :  { %v1167_v39 = vpop.permute.xlu1 %1166 }
0x1330   :  { %v1169_v10 = vmul.f32 %v1167_v39, %v1152_v22 }
0x1332   :  { %v1170_v40 = vpack.c.bf16 %v1169_v10, %v1169_v10 }
0x1334   :  { %1172 = vrot.lane.b32.xlu1 %v1170_v40, %s2131_s20 }
0x139d   :  { %v963_v41 = vpop.permute.xlu0 %962 }
0x139e   :  { %965 = vst.msk [vmem:[#allocation2 + $0x18] sm:$0xf] %vm516_vm15, %v963_v41  ;;  %1951 = vmatmul.mubr.msk.bf16.vlgmr.msra.gmra.mrb[16].mxu0 %vm40_vm0, %v963_v41 }
0x139f   :  { %1967 = vmatpush3.bf16.msra.mxu0 %v2524_v35  ;;  %1970 = vmatprep.mubr.msk.bf16.mxu0 %vm2133_vm14, %v2132_v11 }
0x13a0   :  { %1968 = vmatprep.subr.bf16.mxu0 %v2132_v11 }
0x13a3   :  { %1969 = vmatpush3.bf16.msra.mxu0 %v2531_v9 }
0x13a4   :  { %1974 = vmatprep.subr.bf16.mxu0 %v2132_v11 }
0x13a6   :  { %v1173_v12 = vpop.permute.xlu1 %1172 }
0x13a7   :  { %1971 = vmatmul.mubr.msk.bf16.vlgmr.msra.gmra.mrb[20].mxu0 %vm40_vm0, %v1173_v12 }
0x13a8   :  { %1975 = vmatpush3.bf16.msra.mxu0 %v2524_v35  ;;  %1978 = vmatprep.mubr.msk.bf16.mxu0 %vm2133_vm14, %v2132_v11 }
0x13a9   :  { %1976 = vmatprep.subr.bf16.mxu0 %v2132_v11 }
0x13ac   :  { %1977 = vmatpush3.bf16.msra.mxu0 %v2531_v9 }
0x13ad   :  { %1990 = vmatprep.subr.bf16.mxu0 %v2132_v11 }
0x1471   :  { %v1003_v42 = vpop.f32.mrb[16].mxu0 }
0x1472   :  { %v1009_v43 = vadd.f32 %v1003_v42, %v483_v29  ;;  %v1952_v45 = vpop.f32.mrb[17].mxu0 }
0x1473   :  { %v1006_v46 = vpop.f32.mrb[18].mxu0 }
0x1474   :  { %v1953_v48 = vpop.f32.mrb[19].mxu0  ;;  %v1010_v63 = vmul.f32 %v1009_v43, %v2279_v57 }
0x147a   :  { %v1223_v50 = vpop.f32.mrb[20].mxu0 }
0x147b   :  { %v1229_v38 = vadd.f32 %v1223_v50, %v1117_v49  ;;  %v1972_v51 = vpop.f32.mrb[21].mxu0 }
0x147c   :  { %v1226_v52 = vpop.f32.mrb[22].mxu0 }
0x147d   :  { %v1230_v55 = vmul.f32 %v1229_v38, %v2279_v57  ;;  %v1973_v58 = vpop.f32.mrb[23].mxu0 }
0x147e   :  { %v1125_v58 = vadd.f32 %v2503_v14, %v2498_v6 }
0x147f   :  { %2080 = vtanh.f32 %v1230_v55 }
0x1480   :  { %2082 = vtanh.f32 %v1010_v63 }
0x1489   :  { %v2081_v59 = vpop.eup %2080 }
0x148a   :  { %v1232_v61 = vmul.f32 %v2081_v59, %v2279_v57  ;;  %v2083_v3 = vpop.eup %2082 }
0x148b   :  { %v1012_v4 = vmul.f32 %v2083_v3, %v2279_v57 }
0x148c   :  { %v1233_v54 = vadd.f32 %v1232_v61, %v2285_v0 }
0x148d   :  { %v1013_v13 = vadd.f32 %v1012_v4, %v2285_v0 }
0x148e   :  { %1236 = vrot.lane.b32.xlu0 %v1233_v54, %s2130_s19  ;;  %v1234_v1 = vmul.f32 %v1233_v54, %v1163_v32 }
0x148f   :  { %v1014_v19 = vmul.f32 %v1013_v13, %v2516_v28 }
0x1500   :  { %v1237_v47 = vpop.permute.xlu0 %1236 }
0x1501   :  { %v1239_v62 = vmul.f32 %v1237_v47, %v1233_v54 }
0x1503   :  { %1241 = vrot.lane.b32.xlu1 %v1239_v62, %s2131_s20 }
0x1575   :  { %v1242_v60 = vpop.permute.xlu1 %1241 }
0x1576   :  { %v1244_v2 = vadd.f32 %v1242_v60, %v1234_v1 }
0x1578   :  { %2084 = vtanh.f32 %v1244_v2 }
0x1582   :  { %v2085_v5 = vpop.eup %2084 }
0x1583   :  { %1247 = vrot.lane.b32.xlu0 %v2085_v5, %s2130_s19 }
0x1587   :  { %1016 = vrot.lane.b32.xlu0 %v1013_v13, %s2130_s19 }
0x15f5   :  { %v1248_v56 = vpop.permute.xlu0 %1247 }
0x15f6   :  { %v1250_v44 = vmul.f32 %v1248_v56, %v1233_v54 }
0x15f8   :  { %v1251_v15 = vpack.c.bf16 %v1250_v44, %v1250_v44 }
0x15f9   :  { %v1017_v16 = vpop.permute.xlu0 %1016 }
0x15fa   :  { %v1019_v17 = vmul.f32 %v1017_v16, %v1013_v13  ;;  %1253 = vrot.lane.b32.xlu1 %v1251_v15, %s2131_s20 }
0x15fc   :  { %1021 = vrot.lane.b32.xlu0 %v1019_v17, %s2131_s20 }
0x166c   :  { %v1254_v18 = vpop.permute.xlu1 %1253 }
0x166d   :  { %1979 = vmatmul.mubr.msk.bf16.vlgmr.msra.gmra.mrb[24].mxu0 %vm40_vm0, %v1254_v18 }
0x166e   :  { %v1022_v21 = vpop.permute.xlu0 %1021  ;;  %1991 = vmatpush3.bf16.msra.mxu0 %v2524_v35  ;;  %1994 = vmatprep.mubr.msk.bf16.mxu0 %vm2133_vm14, %v2132_v11 }
0x166f   :  { %v1024_v22 = vadd.f32 %v1022_v21, %v1014_v19  ;;  %1992 = vmatprep.subr.bf16.mxu0 %v2132_v11 }
0x1671   :  { %2086 = vtanh.f32 %v1024_v22 }
0x1672   :  { %1993 = vmatpush3.bf16.msra.mxu0 %v2531_v9 }
0x1673   :  { %2006 = vmatprep.subr.bf16.mxu0 %v2132_v11 }
0x167b   :  { %v2087_v23 = vpop.eup %2086 }
0x167c   :  { %1027 = vrot.lane.b32.xlu0 %v2087_v23, %s2130_s19 }
0x1680   :  { %889 = vrot.lane.b32.xlu0 %v888_v24, %s2131_s20 }
0x16ee   :  { %v1028_v25 = vpop.permute.xlu0 %1027 }
0x16ef   :  { %v1030_v41 = vmul.f32 %v1028_v25, %v1013_v13 }
0x16f1   :  { %v1031_v12 = vpack.c.bf16 %v1030_v41, %v1030_v41 }
0x16f2   :  { %v890_v26 = vpop.permute.xlu0 %889 }
0x16f3   :  { %892 = vst.msk [vmem:[#allocation2 + $0x10] sm:$0xf0] %vm601_vm1, %v890_v26  ;;  %v1033_v42 = vrot.slane %v1031_v12, 4 }
0x16fa   :  { %v1040_v8 = vld [vmem:[#allocation2 + $0x10] sm:$0xff] }
0x16fb   :  { %1962 = vmatprep.mubr.msk.bf16.mxu1 %vm40_vm0, %v1040_v8 }
0x1740   :  { %v1292_v28 = vpop.f32.mrb[24].mxu0 }
0x1741   :  { %v1298_v30 = vadd.f32 %v1292_v28, %v1122_v27  ;;  %v1980_v31 = vpop.f32.mrb[25].mxu0 }
0x1742   :  { %v1295_v32 = vpop.f32.mrb[26].mxu0 }
0x1743   :  { %v1299_v33 = vmul.f32 %v1298_v30, %v2279_v57  ;;  %v1981_v34 = vpop.f32.mrb[27].mxu0 }
0x1745   :  { %2088 = vtanh.f32 %v1299_v33 }
0x174f   :  { %v2089_v53 = vpop.eup %2088 }
0x1750   :  { %v1301_v36 = vmul.f32 %v2089_v53, %v2279_v57 }
0x1752   :  { %v1302_v37 = vadd.f32 %v1301_v36, %v2285_v0 }
0x1754   :  { %1305 = vrot.lane.b32.xlu1 %v1302_v37, %s2130_s19  ;;  %v1303_v7 = vmul.f32 %v1302_v37, %v1244_v2 }
0x17c6   :  { %v1306_v20 = vpop.permute.xlu1 %1305 }
0x17c7   :  { %v1308_v39 = vmul.f32 %v1306_v20, %v1302_v37 }
0x17c9   :  { %1310 = vrot.lane.b32.xlu1 %v1308_v39, %s2131_s20 }
0x183b   :  { %v1311_v10 = vpop.permute.xlu1 %1310 }
0x183c   :  { %v1313_v40 = vadd.f32 %v1311_v10, %v1303_v7 }
0x183e   :  { %2090 = vtanh.f32 %v1313_v40 }
0x1848   :  { %v2091_v29 = vpop.eup %2090 }
0x1849   :  { %1316 = vrot.lane.b32.xlu1 %v2091_v29, %s2130_s19 }
0x184d   :  { %1034 = vrot.lane.b32.xlu1 %v1033_v42, %s2131_s20 }
0x18bb   :  { %v1317_v43 = vpop.permute.xlu1 %1316 }
0x18bc   :  { %v1319_v45 = vmul.f32 %v1317_v43, %v1302_v37 }
0x18be   :  { %v1320_v46 = vpack.c.bf16 %v1319_v45, %v1319_v45 }
0x18bf   :  { %v1035_v48 = vpop.permute.xlu1 %1034 }
0x18c0   :  { %1037 = vst.msk [vmem:[#allocation2 + $0x18] sm:$0xf0] %vm601_vm1, %v1035_v48  ;;  %1322 = vrot.lane.b32.xlu0 %v1320_v46, %s2131_s20 }
0x18c7   :  { %v1041_v49 = vld [vmem:[#allocation2 + $0x18] sm:$0xff] }
0x18c8   :  { %1963 = vmatmul.mubr.msk.bf16.gmra.mrb[20].mxu1 %vm40_vm0, %v1041_v49 }
0x18c9   :  { %1986 = vmatprep.mubr.msk.bf16.mxu1 %vm2133_vm14, %v2132_v11 }
0x1932   :  { %v1323_v50 = vpop.permute.xlu0 %1322 }
0x1933   :  { %1987 = vmatmul.mubr.msk.bf16.vlgmr.msra.gmra.mrb[24].mxu1 %vm40_vm0, %v1323_v50 }
0x1934   :  { %1999 = vmatpush3.bf16.msra.mxu1 %v2524_v35  ;;  %2002 = vmatprep.mubr.msk.bf16.mxu1 %vm2133_vm14, %v2132_v11 }
0x1935   :  { %2000 = vmatprep.subr.bf16.mxu1 %v2132_v11 }
0x1938   :  { %2001 = vmatpush3.bf16.msra.mxu1 %v2531_v9 }
0x1939   :  { %2014 = vmatprep.subr.bf16.mxu1 %v2132_v11 }
0x199b   :  { %v2602_v38 = vpop.f32.mrb[20].mxu1 }
0x199c   :  { %v1129_v51 = vpop.f32.mrb[21].mxu1 }
0x199d   :  { %v2604_v52 = vpop.f32.mrb[22].mxu1  ;;  %v1130_v18 = vadd.f32 %v2498_v6, %v1129_v51 }
0x199e   :  { %v2606_v55 = vpop.f32.mrb[23].mxu1 }
0x199f   :  { %v1133_v39 = vadd.f32 %v2498_v6, %v2606_v55 }
0x1a06   :  { %v1361_v59 = vpop.f32.mrb[24].mxu1 }
0x1a07   :  { %v1367_v61 = vadd.f32 %v1361_v59, %v1125_v58  ;;  %v1988_v54 = vpop.f32.mrb[25].mxu1 }
0x1a08   :  { %v1364_v47 = vpop.f32.mrb[26].mxu1 }
0x1a09   :  { %v1368_v62 = vmul.f32 %v1367_v61, %v2279_v57  ;;  %v1989_v63 = vpop.f32.mrb[27].mxu1  ;;  %v1138_v61 = vadd.f32 %v2602_v38, %v2498_v6 }
0x1a0b   :  { %2092 = vtanh.f32 %v1368_v62 }
0x1a15   :  { %v2093_v1 = vpop.eup %2092 }
0x1a16   :  { %v1370_v60 = vmul.f32 %v2093_v1, %v2279_v57 }
0x1a18   :  { %v1371_v2 = vadd.f32 %v1370_v60, %v2285_v0 }
0x1a1a   :  { %1374 = vrot.lane.b32.xlu1 %v1371_v2, %s2130_s19  ;;  %v1372_v14 = vmul.f32 %v1371_v2, %v1313_v40 }
0x1a8c   :  { %v1375_v3 = vpop.permute.xlu1 %1374 }
0x1a8d   :  { %v1377_v4 = vmul.f32 %v1375_v3, %v1371_v2 }
0x1a8f   :  { %1379 = vrot.lane.b32.xlu0 %v1377_v4, %s2131_s20 }
0x1b01   :  { %v1380_v5 = vpop.permute.xlu0 %1379 }
0x1b02   :  { %v1382_v13 = vadd.f32 %v1380_v5, %v1372_v14 }
0x1b04   :  { %2094 = vtanh.f32 %v1382_v13 }
0x1b0e   :  { %v2095_v56 = vpop.eup %2094 }
0x1b0f   :  { %1385 = vrot.lane.b32.xlu1 %v2095_v56, %s2130_s19 }
0x1b81   :  { %v1386_v44 = vpop.permute.xlu1 %1385 }
0x1b82   :  { %v1388_v15 = vmul.f32 %v1386_v44, %v1371_v2 }
0x1b84   :  { %v1389_v16 = vpack.c.bf16 %v1388_v15, %v1388_v15 }
0x1b86   :  { %1391 = vrot.lane.b32.xlu0 %v1389_v16, %s2131_s20 }
0x1bf8   :  { %v1392_v17 = vpop.permute.xlu0 %1391 }
0x1bf9   :  { %1995 = vmatmul.mubr.msk.bf16.vlgmr.msra.gmra.mrb[28].mxu0 %vm40_vm0, %v1392_v17 }
0x1bfa   :  { %2007 = vmatpush3.bf16.msra.mxu0 %v2524_v35  ;;  %2010 = vmatprep.mubr.msk.bf16.mxu0 %vm2133_vm14, %v2132_v11 }
0x1bfb   :  { %2008 = vmatprep.subr.bf16.mxu0 %v2132_v11 }
0x1bfe   :  { %2009 = vmatpush3.bf16.msra.mxu0 %v2531_v9 }
0x1bff   :  { %2022 = vmatprep.subr.bf16.mxu0 %v2132_v11 }
0x1ccc   :  { %v1430_v19 = vpop.f32.mrb[28].mxu0 }
0x1ccd   :  { %v1436_v21 = vadd.f32 %v1430_v19, %v1130_v18  ;;  %v1996_v22 = vpop.f32.mrb[29].mxu0  ;;  %v1141_v19 = vadd.f32 %v2604_v52, %v2498_v6 }
0x1cce   :  { %v1433_v23 = vpop.f32.mrb[30].mxu0 }
0x1ccf   :  { %v1437_v24 = vmul.f32 %v1436_v21, %v2279_v57  ;;  %v1997_v25 = vpop.f32.mrb[31].mxu0 }
0x1cd1   :  { %2096 = vtanh.f32 %v1437_v24 }
0x1cdb   :  { %v2097_v26 = vpop.eup %2096 }
0x1cdc   :  { %v1439_v8 = vmul.f32 %v2097_v26, %v2279_v57 }
0x1cde   :  { %v1440_v27 = vadd.f32 %v1439_v8, %v2285_v0 }
0x1ce0   :  { %1443 = vrot.lane.b32.xlu1 %v1440_v27, %s2130_s19  ;;  %v1441_v31 = vmul.f32 %v1440_v27, %v1382_v13 }
0x1d52   :  { %v1444_v28 = vpop.permute.xlu1 %1443 }
0x1d53   :  { %v1446_v30 = vmul.f32 %v1444_v28, %v1440_v27 }
0x1d55   :  { %1448 = vrot.lane.b32.xlu0 %v1446_v30, %s2131_s20 }
0x1dc7   :  { %v1449_v32 = vpop.permute.xlu0 %1448 }
0x1dc8   :  { %v1451_v33 = vadd.f32 %v1449_v32, %v1441_v31 }
0x1dca   :  { %2098 = vtanh.f32 %v1451_v33 }
0x1dd4   :  { %v2099_v34 = vpop.eup %2098 }
0x1dd5   :  { %1454 = vrot.lane.b32.xlu1 %v2099_v34, %s2130_s19 }
0x1e47   :  { %v1455_v53 = vpop.permute.xlu1 %1454 }
0x1e48   :  { %v1457_v36 = vmul.f32 %v1455_v53, %v1440_v27 }
0x1e4a   :  { %v1458_v37 = vpack.c.bf16 %v1457_v36, %v1457_v36 }
0x1e4c   :  { %1460 = vrot.lane.b32.xlu0 %v1458_v37, %s2131_s20 }
0x1ebe   :  { %v1461_v20 = vpop.permute.xlu0 %1460 }
0x1ebf   :  { %2003 = vmatmul.mubr.msk.bf16.vlgmr.msra.gmra.mrb[28].mxu1 %vm40_vm0, %v1461_v20  ;;  %v1825_v20 = vld [vmem:[%s2689_s6] ss:$0 sm:$0xff] }
0x1ec0   :  { %2015 = vmatpush3.bf16.msra.mxu1 %v2524_v35  ;;  %2018 = vmatprep.mubr.msk.bf16.mxu1 %vm2133_vm14, %v2132_v11 }
0x1ec1   :  { %2016 = vmatprep.subr.bf16.mxu1 %v2132_v11 }
0x1ec4   :  { %2017 = vmatpush3.bf16.msra.mxu1 %v2531_v9 }
0x1f92   :  { %v1499_v7 = vpop.f32.mrb[28].mxu1 }
0x1f93   :  { %v1505_v10 = vadd.f32 %v1499_v7, %v1133_v39  ;;  %v2004_v40 = vpop.f32.mrb[29].mxu1 }
0x1f94   :  { %v1502_v41 = vpop.f32.mrb[30].mxu1 }
0x1f95   :  { %v1506_v12 = vmul.f32 %v1505_v10, %v2279_v57  ;;  %v2005_v29 = vpop.f32.mrb[31].mxu1 }
0x1f97   :  { %2100 = vtanh.f32 %v1506_v12 }
0x1fa1   :  { %v2101_v42 = vpop.eup %2100 }
0x1fa2   :  { %v1508_v35 = vmul.f32 %v2101_v42, %v2279_v57 }
0x1fa4   :  { %v1509_v43 = vadd.f32 %v1508_v35, %v2285_v0 }
0x1fa6   :  { %1512 = vrot.lane.b32.xlu1 %v1509_v43, %s2130_s19  ;;  %v1510_v46 = vmul.f32 %v1509_v43, %v1451_v33  ;;  %v2046_v33 = vld [vmem:[%s2688_s5] sm:$0xff]  }
0x2018   :  { %v1513_v45 = vpop.permute.xlu1 %1512 }
0x2019   :  { %v1515_v9 = vmul.f32 %v1513_v45, %v1509_v43 }
0x201b   :  { %1517 = vrot.lane.b32.xlu0 %v1515_v9, %s2131_s20 }
0x208d   :  { %v1518_v48 = vpop.permute.xlu0 %1517 }
0x208e   :  { %v1520_v49 = vadd.f32 %v1518_v48, %v1510_v46 }
0x2090   :  { %2102 = vtanh.f32 %v1520_v49 }
0x209a   :  { %v2103_v50 = vpop.eup %2102 }
0x209b   :  { %1523 = vrot.lane.b32.xlu1 %v2103_v50, %s2130_s19 }
0x210d   :  { %v1524_v51 = vpop.permute.xlu1 %1523 }
0x210e   :  { %v1526_v55 = vmul.f32 %v1524_v51, %v1509_v43 }
0x2110   :  { %v1527_v58 = vpack.c.bf16 %v1526_v55, %v1526_v55 }
0x2112   :  { %1529 = vrot.lane.b32.xlu0 %v1527_v58, %s2131_s20 }
0x2184   :  { %v1530_v59 = vpop.permute.xlu0 %1529 }
0x2185   :  { %2011 = vmatmul.mubr.msk.bf16.vlgmr.msra.gmra.mrb[32].mxu0 %vm40_vm0, %v1530_v59 }
0x2186   :  { %2026 = vmatprep.mubr.msk.bf16.mxu0 %vm2133_vm14, %v2132_v11  ;;  %2023 = vmatpush3.bf16.msra.mxu0 %v2046_v33 }
0x2187   :  { %2024 = vmatprep.subr.bf16.mxu0 %v2132_v11 }
0x2258   :  { %v1568_v54 = vpop.f32.mrb[32].mxu0 }
0x2259   :  { %v1574_v47 = vadd.f32 %v1568_v54, %v1138_v61  ;;  %v2012_v62 = vpop.f32.mrb[33].mxu0 }
0x225a   :  { %v1571_v63 = vpop.f32.mrb[34].mxu0 }
0x225b   :  { %v1575_v1 = vmul.f32 %v1574_v47, %v2279_v57  ;;  %v2013_v60 = vpop.f32.mrb[35].mxu0 }
0x225d   :  { %2104 = vtanh.f32 %v1575_v1 }
0x2267   :  { %v2105_v2 = vpop.eup %2104 }
0x2268   :  { %v1577_v3 = vmul.f32 %v2105_v2, %v2279_v57 }
0x226a   :  { %v1578_v4 = vadd.f32 %v1577_v3, %v2285_v0 }
0x226c   :  { %1581 = vrot.lane.b32.xlu1 %v1578_v4, %s2130_s19  ;;  %v1579_v38 = vmul.f32 %v1578_v4, %v1520_v49 }
0x22de   :  { %v1582_v14 = vpop.permute.xlu1 %1581 }
0x22df   :  { %v1584_v5 = vmul.f32 %v1582_v14, %v1578_v4 }
0x22e1   :  { %1586 = vrot.lane.b32.xlu0 %v1584_v5, %s2131_s20 }
0x2353   :  { %v1587_v13 = vpop.permute.xlu0 %1586 }
0x2354   :  { %v1589_v56 = vadd.f32 %v1587_v13, %v1579_v38 }
0x2356   :  { %2106 = vtanh.f32 %v1589_v56 }
0x2360   :  { %v2107_v44 = vpop.eup %2106 }
0x2361   :  { %1592 = vrot.lane.b32.xlu1 %v2107_v44, %s2130_s19 }
0x23d3   :  { %v1593_v15 = vpop.permute.xlu1 %1592 }
0x23d4   :  { %v1595_v16 = vmul.f32 %v1593_v15, %v1578_v4 }
0x23d6   :  { %v1596_v17 = vpack.c.bf16 %v1595_v16, %v1595_v16 }
0x23d8   :  { %1598 = vrot.lane.b32.xlu0 %v1596_v17, %s2131_s20 }
0x244a   :  { %v1599_v18 = vpop.permute.xlu0 %1598 }
0x244b   :  { %2019 = vmatmul.mubr.msk.bf16.vlgmr.msra.gmra.mrb[32].mxu1 %vm40_vm0, %v1599_v18 }
0x251e   :  { %v1637_v21 = vpop.f32.mrb[32].mxu1 }
0x251f   :  { %v1643_v22 = vadd.f32 %v1637_v21, %v1141_v19  ;;  %v2020_v23 = vpop.f32.mrb[33].mxu1 }
0x2520   :  { %v1640_v24 = vpop.f32.mrb[34].mxu1 }
0x2521   :  { %v1644_v25 = vmul.f32 %v1643_v22, %v2279_v57  ;;  %v2021_v26 = vpop.f32.mrb[35].mxu1 }
0x2523   :  { %2108 = vtanh.f32 %v1644_v25 }
0x252d   :  { %v2109_v8 = vpop.eup %2108 }
0x252e   :  { %v1646_v27 = vmul.f32 %v2109_v8, %v2279_v57  ;;  %v2047_v57 = vld [vmem:[%s2688_s5 + $0x8] sm:$0xff]  }
0x252f   :  { %2025 = vmatpush3.bf16.msra.mxu0 %v2047_v57 }
0x2530   :  { %v1647_v28 = vadd.f32 %v1646_v27, %v2285_v0 }
0x2532   :  { %1650 = vrot.lane.b32.xlu1 %v1647_v28, %s2130_s19  ;;  %v1648_v6 = vmul.f32 %v1647_v28, %v1589_v56 }
0x25a4   :  { %v1651_v30 = vpop.permute.xlu1 %1650 }
0x25a5   :  { %v1653_v31 = vmul.f32 %v1651_v30, %v1647_v28 }
0x25a7   :  { %1655 = vrot.lane.b32.xlu0 %v1653_v31, %s2131_s20 }
0x2619   :  { %v1656_v52 = vpop.permute.xlu0 %1655 }
0x261a   :  { %v1658_v32 = vadd.f32 %v1656_v52, %v1648_v6 }
0x261c   :  { %2110 = vtanh.f32 %v1658_v32 }
0x2626   :  { %v2111_v0 = vpop.eup %2110 }
0x2627   :  { %1661 = vrot.lane.b32.xlu1 %v2111_v0, %s2130_s19 }
0x2699   :  { %v1662_v34 = vpop.permute.xlu1 %1661 }
0x269a   :  { %v1664_v53 = vmul.f32 %v1662_v34, %v1647_v28 }
0x269c   :  { %v1665_v36 = vpack.c.bf16 %v1664_v53, %v1664_v53 }
0x269e   :  { %1678 = vrot.lane.b32.xlu0 %v1665_v36, %s2131_s20 }
0x2710   :  { %v1679_v37 = vpop.permute.xlu0 %1678 }
0x2711   :  { %2027 = vmatmul.mubr.msk.bf16.vlgmr.msra.gmra.mrb[36].mxu0 %vm40_vm0, %v1679_v37 }
0x27e4   :  { %v1729_v39 = vpop.f32.mrb[36].mxu0 }
0x27e5   :  { %v1730_v7 = vadd.f32 %v1825_v20, %v1729_v39  ;;  %v2028_v10 = vpop.f32.mrb[37].mxu0 }
0x27e6   :  { %v1732_v11 = vpop.f32.mrb[38].mxu0 }
0x27e7   :  { %1735 = vst [vmem:[%s2690_s7] sm:$0xff] %v1730_v7  ;;  %v2029_v40 = vpop.f32.mrb[39].mxu0 }
0x27e8   :  { %1740 = vsyncpa [#allocation4], 1 }

</bundles_post_ra>
